<compile_context>
chip_gen: v6e
topology: v6e:2x2x1
jax: 0.10.0
libtpu: 0.0.40
codegen_flags: <defaults>
</compile_context>

<pallas_src>
import math

import jax
import jax.numpy as jnp
from jax.experimental import pallas as pl
from jax.experimental.pallas import tpu as pltpu

_MiB = 1024 * 1024
_LANE = 128
_TILE_CANDIDATES = (2048, 1024, 512, 256, 128)


def _vmem_budget():
    """Returns (vmem_limit_cap_bytes, max_block_bytes) per TPU generation."""
    cap = 64 * _MiB  # conservative default (v7x-class) if query fails
    try:
        info = pltpu.get_tpu_info()
        cap = int(getattr(info, "vmem_capacity_bytes", cap))
    except Exception:
        pass
    if cap <= 64 * _MiB:
        # v7x: 64 MiB VMEM per TensorCore.  Cap blocks at 1024x1024 f32 and
        # leave headroom for Mosaic-internal scratch under a 48 MiB limit.
        return 48 * _MiB, 4 * _MiB
    # v5e / v6e: 128 MiB physical VMEM -> bigger blocks, up to 96 MiB limit.
    return 96 * _MiB, 12 * _MiB


def _lane_tiles(dim):
    """Lane-friendly (multiple-of-128) tile sizes that divide `dim`, largest first."""
    return [t for t in _TILE_CANDIDATES if dim % t == 0]


def _t2c_tile_kernel(x_ref, o_ref):
    # x_ref: (tl, tc) tile of x[b];  o_ref: (tc, tl) tile of out[b].
    # TODO(synk): for bf16/int8 inputs the packed-sublane XLU transpose could
    # be run at 32-bit granularity via a pltpu.bitcast 2xbf16->u32 pack; not
    # needed while the kernel stays HBM-bound.
    o_ref[...] = x_ref[...].T


def _t2c_batched_kernel(x_ref, o_ref):
    # x_ref: (bb, L, C);  o_ref: (bb, C, L).
    o_ref[...] = jnp.transpose(x_ref[...], (0, 2, 1))


def trans2conv(x, *, block_bytes_cap=None):
    """Trans2Conv forward: (B, L, C) -> (B, C, H, W) with H == W == sqrt(L)."""
    B, L, C = x.shape
    h = math.isqrt(L)
    assert h * h == L, "sequence length must be a perfect square"
    w = h

    itemsize = jnp.dtype(x.dtype).itemsize
    vmem_cap, max_block_bytes = _vmem_budget()
    if block_bytes_cap is not None:
        max_block_bytes = min(max_block_bytes, int(block_bytes_cap))

    # Narrow-lane output (L < 128): masked partial stores + call overhead make
    # a Pallas kernel a loss; XLA's transpose already hits roofline here.
    if L < _LANE:
        return jnp.transpose(x, (0, 2, 1)).reshape(B, C, h, w)

    # ---- tile selection ----------------------------------------------------
    tl_opts = _lane_tiles(L) or [L]  # prefer lane-dense L tiles, else full L
    tl = tc = None

    # 1) Full C extent (one contiguous HBM slab per input DMA), largest tl.
    for t in tl_opts:
        if t * C * itemsize <= max_block_bytes:
            tl, tc = t, C
            break

    # 2) C too wide for the budget: tile C as well (strided but lane-dense reads).
    if tl is None:
        tc_opts = _lane_tiles(C)
        for t in tl_opts:
            for c in tc_opts:
                if t * c * itemsize <= max_block_bytes:
                    tl, tc = t, c
                    break
            if tl is not None:
                break

    # 3) No VMEM-friendly tiling (huge, non-128-aligned dims): don't risk a
    #    giant un-pipelineable slab -- XLA transpose instead.
    if tl is None:
        return jnp.transpose(x, (0, 2, 1)).reshape(B, C, h, w)

    n_l = L // tl
    n_c = C // tc
    block_bytes = tl * tc * itemsize

    if n_l == 1 and n_c == 1:
        # Whole (L, C) slab per batch element: pack a few batch elements per
        # step to amortize the ~0.35us/step overhead, but keep >=2 grid steps
        # when possible so the DMA pipeline (and v7x's 2nd TC) have work.
        bb_cap = max(1, max_block_bytes // block_bytes)
        if B >= 2:
            bb_cap = min(bb_cap, B // 2)
        bb_cap = max(1, min(bb_cap, B))
        bb = 1
        for cand in range(bb_cap, 0, -1):
            if B % cand == 0:
                bb = cand
                break
        grid = (B // bb,)
        in_spec = pl.BlockSpec((bb, L, C), lambda s: (s, 0, 0))
        out_spec = pl.BlockSpec((bb, C, L), lambda s: (s, 0, 0))
        kernel = _t2c_batched_kernel
        block_bytes *= bb
    else:
        # Flattened 1-D parallel grid, L-tile index fastest:
        #   * consecutive steps write consecutive slices of the output's last
        #     dim (L) -> sequential HBM writeback;
        #   * single parallel axis of extent B*n_c*n_l keeps both v7x
        #     TensorCores issuing DMAs even when B == 1.
        grid = (B * n_c * n_l,)
        steps_per_batch = n_c * n_l

        def _decode(s):
            b = s // steps_per_batch
            r = s % steps_per_batch
            return b, r // n_l, r % n_l  # (batch, C-tile j, L-tile i)

        def in_map(s):
            b, j, i = _decode(s)
            return (b, i, j)

        def out_map(s):
            b, j, i = _decode(s)
            return (b, j, i)

        in_spec = pl.BlockSpec((pl.Squeezed(), tl, tc), in_map)
        out_spec = pl.BlockSpec((pl.Squeezed(), tc, tl), out_map)
        kernel = _t2c_tile_kernel

    # 2 in + 2 out double buffers plus ~50% headroom for compiler scratch,
    # clamped to the per-generation safe limit (48 MiB v7x / 96 MiB v5e-v6e).
    # (If profiles ever show DMA-wait gaps, pipeline_mode=pl.Buffered(3) on the
    #  input spec is the next sweep -- VMEM headroom permitting.)
    vmem_limit = int(min(vmem_cap, max(16 * _MiB, 6 * block_bytes)))

    out_bcl = pl.pallas_call(
        kernel,
        out_shape=jax.ShapeDtypeStruct((B, C, L), x.dtype),
        grid_spec=pltpu.PrefetchScalarGridSpec(
            num_scalar_prefetch=0,
            grid=grid,
            in_specs=[in_spec],
            out_specs=out_spec,
        ),
        compiler_params=pltpu.CompilerParams(
            dimension_semantics=("parallel",),
            vmem_limit_bytes=vmem_limit,
        ),
    )(x)

    # Pure row-major metadata reshape == torch .view on a contiguous tensor.
    return out_bcl.reshape(B, C, h, w)


def _reference(x):
    B, L, C = x.shape
    h = math.isqrt(L)
    return jnp.transpose(x, (0, 2, 1)).reshape(B, C, h, h)


if __name__ == "__main__":
    key = jax.random.PRNGKey(0)
    k1, k2, k3 = jax.random.split(key, 3)

    # 1) Tiny shape (L < 128): XLA-transpose fallback. seq=16 -> 4x4, hidden=32.
    x_small = jax.random.normal(k1, (2, 16, 32), dtype=jnp.float32)
    out_small = jax.block_until_ready(trans2conv(x_small))
    assert out_small.shape == (2, 32, 4, 4), out_small.shape
    assert out_small.dtype == x_small.dtype
    assert jnp.allclose(out_small, _reference(x_small)), "mismatch (small)"

    # 2) Lane-dense shape, contiguous full-slab-per-batch Pallas path:
    #    seq=1024 -> 32x32, hidden=256.
    x_med = jax.random.normal(k2, (2, 1024, 256), dtype=jnp.float32)
    out_med = jax.block_until_ready(trans2conv(x_med))
    assert out_med.shape == (2, 256, 32, 32), out_med.shape
    assert out_med.dtype == x_med.dtype
    assert jnp.allclose(out_med, _reference(x_med)), "mismatch (medium)"

    # 3) Tiled flattened-grid Pallas path (block cap forced down so L splits
    #    into multiple lane-dense tiles): seq=1024 -> 32x32, hidden=512.
    x_tiled = jax.random.normal(k3, (1, 1024, 512), dtype=jnp.float32)
    out_tiled = jax.block_until_ready(
        trans2conv(x_tiled, block_bytes_cap=1 * 1024 * 1024))
    assert out_tiled.shape == (1, 512, 32, 32), out_tiled.shape
    assert out_tiled.dtype == x_tiled.dtype
    assert jnp.allclose(out_tiled, _reference(x_tiled)), "mismatch (tiled)"

    print("KERNEL_OK")
</pallas_src>

<mosaic_0001>
module attributes {stable_mosaic.version = 11 : i64} {
  func.func @_t2c_batched_kernel(%arg0: i32, %arg1: memref<1x1024x256xf32, #tpu.memory_space<vmem>>, %arg2: memref<1x256x1024xf32, #tpu.memory_space<vmem>>) attributes {dimension_semantics = [#tpu.dimension_semantics<parallel>], iteration_bounds = array<i64: 2>, scalar_prefetch = 0 : i64, scratch_operands = 0 : i64, tpu.core_type = #tpu.core_type<tc>, window_params = [{transform_indices = @transform_0, window_bounds = array<i64: 1, 1024, 256>}, {transform_indices = @transform_1, window_bounds = array<i64: 1, 256, 1024>}]} {
    %c0 = arith.constant 0 : index
    %c0_0 = arith.constant 0 : index
    %c0_1 = arith.constant 0 : index
    %0 = vector.load %arg1[%c0, %c0_0, %c0_1] : memref<1x1024x256xf32, #tpu.memory_space<vmem>>, vector<1x1024x256xf32>
    %1 = tpu.transpose %0, [0, 2, 1] : vector<1x1024x256xf32> -> vector<1x256x1024xf32>
    %c0_2 = arith.constant 0 : index
    %c0_3 = arith.constant 0 : index
    %c0_4 = arith.constant 0 : index
    %2 = vector.load %arg2[%c0_2, %c0_3, %c0_4] : memref<1x256x1024xf32, #tpu.memory_space<vmem>>, vector<1x256x1024xf32>
    tpu.vector_store %arg2[%c0_2, %c0_3, %c0_4], %1 {strides = array<i32>} : memref<1x256x1024xf32, #tpu.memory_space<vmem>>, vector<1x256x1024xf32>,
    return
  }
  func.func @transform_0(%arg0: i32) -> (i32, i32, i32) {
    %c0_i32 = arith.constant 0 : i32
    %c0_i32_0 = arith.constant 0 : i32
    %c0_i32_1 = arith.constant 0 : i32
    return %arg0, %c0_i32, %c0_i32_0 : i32, i32, i32
  }
  func.func @transform_1(%arg0: i32) -> (i32, i32, i32) {
    %c0_i32 = arith.constant 0 : i32
    %c0_i32_0 = arith.constant 0 : i32
    %c0_i32_1 = arith.constant 0 : i32
    return %arg0, %c0_i32, %c0_i32_0 : i32, i32, i32
  }
}

</mosaic_0001>

<bundles_post_ra>
// kernel: tpu_custom_call.1
= control target key start
LH: loop header
LB: loop body
LE: loop exit
PB: predicated region body
PF: predicated region fallthrough
CT: control target
= control target key end

     0   :  { %6 = vsyncpa [#allocation3], 0  ;;  %s2097_s0 = inlined_call_operand.hbm [shape: f32[2,1024,256], index: 0, kind: input, shape index: {}]   ;;  %s2098_s1 = inlined_call_operand.hbm [shape: f32[2,256,1024], index: 1, kind: output, shape index: {}]  }
   0x1   :  { %8 = vsyncpa [#allocation3 + $0x1], 0 }
   0x2   :  { %9 = vsyncpa [#allocation4], 0 }
   0x3   :  { %11 = vsyncpa [#allocation4 + $0x1], 0  ;;  %s1422_s6 = smov 0   ;;  %s1424_s7 = smov 0  }
   0x4   :  { %s1426_s8 = smov 0   ;;  %s1428_s9 = smov 0  }
   0x5 LB: > { %s1443_s10 = sadd.s32 4294967295, %s1404_s9   ;;  %s1246_s11 = sadd.s32 4294967294, %s1404_s9   ;;  %s1404_s9 = sphi %s1428_s9, %s2113_s9   ;;  %s1400_s8 = sphi %s1426_s8, %s2112_s8   ;;  %s1396_s7 = sphi %s1424_s7, %s2111_s7   ;;  %s1392_s6 = sphi %s1422_s6, %s2110_s6  }
   0x6   : > { %s1447_s12 = sadd.s32 1, %s1404_s9   ;;  %s24_s13 = sadd.s32 1, %s1400_s8 }
   0x7   : > { %s21_s14 = ssub.s32 %s1404_s9, %s1447_s12  ;;  %p31_p0 = scmp.ne.s32.totalorder %s1400_s8, %s1396_s7 }
   0x8   : > { %p22_p1 = scmp.eq.s32.totalorder %s21_s14, 0  ;;  %p32_p2 = scmp.eq.s32.totalorder %s1404_s9, 0 }
   0x9   : > { %p37_p3 = scmp.ne.s32.totalorder %s1396_s7, %s1392_s6  ;;  %p38_p4 = scmp.eq.s32.totalorder %s1443_s10, 0 }
   0xa   : > { %s1459_s15 = scalar_select %p22_p1, %s1400_s8, %s24_s13  }
   0xb   : > { %p1461_p5 = por %p32_p2, %p31_p0  ;;  %p1465_p6 = por %p38_p4, %p37_p3 }
   0xc   : > { %p61_p7 = scmp.eq.s32.totalorder %s1443_s10, 1  ;;  %p67_p8 = scmp.eq.s32.totalorder %s1246_s11, 1 }
   0xd   : > { %s2102_s17 = scalar_select %p1465_p6, 1, 0 }
   0xe   : > { %p1274_p10 = scmp.lt.s32.totalorder %s1404_s9, 2  ;;  %p1472_p11 = por %p61_p7, %p31_p0 }
   0xf   : > { %p1476_p12 = por %p67_p8, %p37_p3  ;;  %s87_s20 = sand.u32 1, %s1400_s8  }
  0x10   : > { %s2103_s18 = scalar_select %p1472_p11, 1, 0 }
  0x11   : > { %s2104_s19 = scalar_select %p1476_p12, 1, 0 }
  0x12   : > { %s1260_s21 = sshll.u32 %s1404_s9, 15  ;;  %s1249_s22 = sshll.u32 %s87_s20, 11 }
  0x13   : > { %s1485_s25 = scalar_lea.hbm %s2097_s0, %s1260_s21  ;;  %s91_s26 = scalar_lea.vmem [#allocation2], %s1249_s22 }
  0x14   : > { %s98_s27 = sshll.u32 %s91_s26, 4  ;;  %p1489_p13 = pnand %p1274_p10, %p1461_p5  ;;  %s1493_s27 = int_to_ptr.vmem [resolvable:$true] %s98_s27 }
  0x15   : > { %s1495_s29 = scalar_lea.sflag [#allocation3], %s87_s20  ;;  %s1312_s30 = scalar_lea.hbm %s1485_s25, 32768 }
  0x16   : > { %p1313_p0 = scmp.ne.s32.totalorder %s1485_s25, %s1312_s30  ;;  %p1314_p1 = pneg %p1489_p13 }
  0x17   : > { %s1317_s4 = scalar_lea.hbm %s2097_s0, 65536  ;;  %p1318_p4 = scmp.lt.s32.totalorder %s1485_s25, %s2097_s0 }
  0x18   : > { %p1315_p2 = pnand %p1314_p1, %p1313_p0  ;;  %p1319_p5 = scmp.lt.s32.totalorder %s1317_s4, %s1312_s30 }
  0x1a   : > { %p1316_p3 = pneg %p1315_p2  ;;  %p1320_p7 = por %p1319_p5, %p1318_p4 }
  0x1c   : > { %p1321_p8 = pnand %p1320_p7, %p1316_p3 }
  0x1e   : > { %1324 = shalt.err (!%p1321_p8)
}
  0x1f   : > { %s1325_s13 = scalar_lea.vmem %s1493_s27, 32768  ;;  %s1406_s14 = smov [#allocation2]  }
  0x20   : > { %p1326_p10 = scmp.ne.s32.totalorder %s1493_s27, %s1325_s13  ;;  %s1330_s16 = sshll.u32 %s1406_s14, 4  ;;  %s1331_s16 = int_to_ptr.vmem [resolvable:$false] %s1330_s16 }
  0x21   : > { %s1332_s20 = scalar_lea.vmem %s1331_s16, 65536  ;;  %p1333_p2 = scmp.lt.s32.totalorder %s1493_s27, %s1331_s16 }
  0x22   : > { %p1328_p9 = pnand %p1326_p10, %p1314_p1  ;;  %p1334_p12 = scmp.lt.s32.totalorder %s1332_s20, %s1325_s13 }
  0x24   : > { %p1329_p0 = pneg %p1328_p9  ;;  %p1335_p11 = por %p1334_p12, %p1333_p2 }
  0x26   : > { %p1336_p6 = pnand %p1335_p11, %p1329_p0 }
  0x28   : > { %1339 = shalt.err (!%p1336_p6)
}
  0x29   : > { %s1407_s21 = smov 256   ;;  %s1408_s22 = smov 16  }
  0x2a   : > { %1269 = dma.hbm_to_vmem [thread:$0]  (!%p1489_p13), %s1485_s25, 32768, %s1493_s27, %s1495_s29, %s1407_s21, %s1407_s21, %s1408_s22  }
  0x2b   : > { %p1252_p9 = scmp.ge.s32.totalorder %s1404_s9, 1  ;;  %p106_p1 = scmp.lt.s32.totalorder %s1404_s9, 3 }
  0x2d   : > { %p107_p3 = pnand %p1252_p9, %p106_p1 }
  0x2e   : > { %s1519_s23 = sand.u32 (!%p107_p3), 1, %s1396_s7   ;;  %p2106_p6 = scmp.ne.s32.totalorder (!%p107_p3), %s2102_s17, 0 }
  0x2f   : > { %110 = sbr.rel (%p107_p3) target bundleno = 701 (0x2bd), region = 24  ;;  %s1253_s24 = sshll.u32 (!%p107_p3), %s1519_s23, 11 }
  0x30   : > { %s113_s26 = scalar_lea.sflag (!%p107_p3), [#allocation3], %s1519_s23  ;;  %s1525_s30 = scalar_lea.vmem (!%p107_p3), [#allocation2], %s1253_s24 }
  0x34   : > { %1383 = dma.done.wait (%p2106_p6), %s113_s26, 32768  }
  0x35   : > { %1385 = vsyncadd (%p2106_p6), %s113_s26, 4294934528  ;;  %v136_v0 = vld [vmem:[%s1525_s30 + $0x8] sm:$0xff]  ;;  %v135_v1 = vld [vmem:[%s1525_s30] sm:$0xff]  ;;  %s1597_s17 = scalar_lea.vmem [#allocation5], %s1253_s24  ;;  %s1261_s25 = sshll.u32 %s1443_s10, 15 }
  0x36   : > { %423 = vxpose.xlu1.b32.start [1/16] %v136_v0, 128  ;;  %391 = vxpose.xlu0.b32.start [1/16] %v135_v1, 128  ;;  %v138_v2 = vld [vmem:[%s1525_s30 + $0x18] sm:$0xff]  ;;  %v137_v3 = vld [vmem:[%s1525_s30 + $0x10] sm:$0xff]  ;;  %v140_v4 = vld [vmem:[%s1525_s30 + $0x28] sm:$0xff]  ;;  %s1173_s27 = sshll.u32 %s1597_s17, 4  ;;  %s2050_s2 = scalar_lea.hbm %s2098_s1, %s1261_s25  ;;  %s2052_s27 = int_to_ptr.vmem [resolvable:$true] %s1173_s27 }
  0x37   : > { %v139_v5 = vld [vmem:[%s1525_s30 + $0x20] sm:$0xff]  ;;  %v142_v6 = vld [vmem:[%s1525_s30 + $0x38] sm:$0xff]  ;;  %v141_v7 = vld [vmem:[%s1525_s30 + $0x30] sm:$0xff]  ;;  %s1160_s10 = scalar_lea.sflag [#allocation4], %s1519_s23  ;;  %s1340_s3 = scalar_lea.vmem %s2052_s27, 32768 }
  0x38   : > { %v144_v8 = vld [vmem:[%s1525_s30 + $0x48] sm:$0xff]  ;;  %v143_v9 = vld [vmem:[%s1525_s30 + $0x40] sm:$0xff]  ;;  %v146_v10 = vld [vmem:[%s1525_s30 + $0x58] sm:$0xff]  ;;  %p1341_p11 = scmp.ne.s32.totalorder %s2052_s27, %s1340_s3  ;;  %p2107_p12 = scmp.ne.s32.totalorder %s2103_s18, 0 }
  0x39   : > { %v145_v11 = vld [vmem:[%s1525_s30 + $0x50] sm:$0xff]  ;;  %v148_v12 = vld [vmem:[%s1525_s30 + $0x68] sm:$0xff]  ;;  %v147_v13 = vld [vmem:[%s1525_s30 + $0x60] sm:$0xff]  ;;  %s1409_s4 = smov [#allocation5]  }
  0x3a   : > { %424 = vxpose.xlu1.b32.cont [2/16] %v138_v2, 128  ;;  %392 = vxpose.xlu0.b32.cont [2/16] %v137_v3, 128  ;;  %v150_v14 = vld [vmem:[%s1525_s30 + $0x78] sm:$0xff]  ;;  %v149_v15 = vld [vmem:[%s1525_s30 + $0x70] sm:$0xff]  ;;  %v152_v16 = vld [vmem:[%s1525_s30 + $0x88] sm:$0xff]  ;;  %p1342_p13 = pnand %p1341_p11, %p2107_p12  ;;  %s1344_s5 = sshll.u32 %s1409_s4, 4  ;;  %s1345_s5 = int_to_ptr.vmem [resolvable:$false] %s1344_s5 }
  0x3b   : > { %v151_v17 = vld [vmem:[%s1525_s30 + $0x80] sm:$0xff]  ;;  %v154_v18 = vld [vmem:[%s1525_s30 + $0x98] sm:$0xff]  ;;  %v153_v19 = vld [vmem:[%s1525_s30 + $0x90] sm:$0xff]  ;;  %s1346_s11 = scalar_lea.vmem %s1345_s5, 65536  ;;  %p1347_p5 = scmp.lt.s32.totalorder %s2052_s27, %s1345_s5 }
  0x3c   : > { %v156_v20 = vld [vmem:[%s1525_s30 + $0xa8] sm:$0xff]  ;;  %v155_v21 = vld [vmem:[%s1525_s30 + $0xa0] sm:$0xff]  ;;  %v158_v22 = vld [vmem:[%s1525_s30 + $0xb8] sm:$0xff]  ;;  %p1343_p4 = pneg %p1342_p13  ;;  %p1348_p7 = scmp.lt.s32.totalorder %s1346_s11, %s1340_s3 }
  0x3d   : > { %v157_v23 = vld [vmem:[%s1525_s30 + $0xb0] sm:$0xff]  ;;  %v160_v24 = vld [vmem:[%s1525_s30 + $0xc8] sm:$0xff]  ;;  %v159_v25 = vld [vmem:[%s1525_s30 + $0xc0] sm:$0xff] }
  0x3e   : > { %425 = vxpose.xlu1.b32.cont [3/16] %v140_v4, 128  ;;  %393 = vxpose.xlu0.b32.cont [3/16] %v139_v5, 128  ;;  %v162_v26 = vld [vmem:[%s1525_s30 + $0xd8] sm:$0xff]  ;;  %v161_v27 = vld [vmem:[%s1525_s30 + $0xd0] sm:$0xff]  ;;  %v164_v28 = vld [vmem:[%s1525_s30 + $0xe8] sm:$0xff]  ;;  %p1349_p8 = por %p1348_p7, %p1347_p5 }
  0x3f   : > { %v163_v29 = vld [vmem:[%s1525_s30 + $0xe0] sm:$0xff]  ;;  %v166_v30 = vld [vmem:[%s1525_s30 + $0xf8] sm:$0xff]  ;;  %v165_v31 = vld [vmem:[%s1525_s30 + $0xf0] sm:$0xff] }
  0x40   : > { %v168_v32 = vld [vmem:[%s1525_s30 + $0x108] sm:$0xff]  ;;  %v167_v33 = vld [vmem:[%s1525_s30 + $0x100] sm:$0xff]  ;;  %v170_v34 = vld [vmem:[%s1525_s30 + $0x118] sm:$0xff]  ;;  %p1350_p10 = pnand %p1349_p8, %p1343_p4 }
  0x41   : > { %v169_v35 = vld [vmem:[%s1525_s30 + $0x110] sm:$0xff]  ;;  %v172_v36 = vld [vmem:[%s1525_s30 + $0x128] sm:$0xff]  ;;  %v171_v37 = vld [vmem:[%s1525_s30 + $0x120] sm:$0xff] }
  0x42   : > { %426 = vxpose.xlu1.b32.cont [4/16] %v142_v6, 128  ;;  %394 = vxpose.xlu0.b32.cont [4/16] %v141_v7, 128  ;;  %v174_v38 = vld [vmem:[%s1525_s30 + $0x138] sm:$0xff]  ;;  %v173_v39 = vld [vmem:[%s1525_s30 + $0x130] sm:$0xff]  ;;  %v176_v40 = vld [vmem:[%s1525_s30 + $0x148] sm:$0xff] }
  0x43   : > { %v175_v41 = vld [vmem:[%s1525_s30 + $0x140] sm:$0xff]  ;;  %v178_v42 = vld [vmem:[%s1525_s30 + $0x158] sm:$0xff]  ;;  %v177_v43 = vld [vmem:[%s1525_s30 + $0x150] sm:$0xff] }
  0x44   : > { %v180_v44 = vld [vmem:[%s1525_s30 + $0x168] sm:$0xff]  ;;  %v179_v45 = vld [vmem:[%s1525_s30 + $0x160] sm:$0xff]  ;;  %v182_v46 = vld [vmem:[%s1525_s30 + $0x178] sm:$0xff] }
  0x45   : > { %v181_v47 = vld [vmem:[%s1525_s30 + $0x170] sm:$0xff]  ;;  %v184_v48 = vld [vmem:[%s1525_s30 + $0x188] sm:$0xff]  ;;  %v183_v49 = vld [vmem:[%s1525_s30 + $0x180] sm:$0xff] }
  0x46   : > { %427 = vxpose.xlu1.b32.cont [5/16] %v144_v8, 128  ;;  %395 = vxpose.xlu0.b32.cont [5/16] %v143_v9, 128  ;;  %v186_v50 = vld [vmem:[%s1525_s30 + $0x198] sm:$0xff]  ;;  %v185_v51 = vld [vmem:[%s1525_s30 + $0x190] sm:$0xff]  ;;  %v188_v52 = vld [vmem:[%s1525_s30 + $0x1a8] sm:$0xff] }
  0x47   : > { %v187_v53 = vld [vmem:[%s1525_s30 + $0x1a0] sm:$0xff]  ;;  %v190_v54 = vld [vmem:[%s1525_s30 + $0x1b8] sm:$0xff]  ;;  %v189_v55 = vld [vmem:[%s1525_s30 + $0x1b0] sm:$0xff] }
  0x48   : > { %v192_v56 = vld [vmem:[%s1525_s30 + $0x1c8] sm:$0xff]  ;;  %v191_v57 = vld [vmem:[%s1525_s30 + $0x1c0] sm:$0xff]  ;;  %v194_v58 = vld [vmem:[%s1525_s30 + $0x1d8] sm:$0xff] }
  0x49   : > { %v193_v59 = vld [vmem:[%s1525_s30 + $0x1d0] sm:$0xff]  ;;  %v196_v60 = vld [vmem:[%s1525_s30 + $0x1e8] sm:$0xff]  ;;  %v195_v61 = vld [vmem:[%s1525_s30 + $0x1e0] sm:$0xff] }
  0x4a   : > { %428 = vxpose.xlu1.b32.cont [6/16] %v146_v10, 128  ;;  %396 = vxpose.xlu0.b32.cont [6/16] %v145_v11, 128  ;;  %v198_v62 = vld [vmem:[%s1525_s30 + $0x1f8] sm:$0xff]  ;;  %v197_v63 = vld [vmem:[%s1525_s30 + $0x1f0] sm:$0xff]  ;;  %v200_v2 = vld [vmem:[%s1525_s30 + $0x208] sm:$0xff] }
  0x4b   : > { %v199_v3 = vld [vmem:[%s1525_s30 + $0x200] sm:$0xff]  ;;  %v202_v6 = vld [vmem:[%s1525_s30 + $0x218] sm:$0xff]  ;;  %v201_v7 = vld [vmem:[%s1525_s30 + $0x210] sm:$0xff] }
  0x4c   : > { %v204_v10 = vld [vmem:[%s1525_s30 + $0x228] sm:$0xff]  ;;  %v203_v11 = vld [vmem:[%s1525_s30 + $0x220] sm:$0xff] }
  0x4e   : > { %429 = vxpose.xlu1.b32.cont [7/16] %v148_v12, 128  ;;  %397 = vxpose.xlu0.b32.cont [7/16] %v147_v13, 128 }
  0x52   : > { %430 = vxpose.xlu1.b32.cont [8/16] %v150_v14, 128  ;;  %398 = vxpose.xlu0.b32.cont [8/16] %v149_v15, 128  ;;  %v206_v14 = vld [vmem:[%s1525_s30 + $0x238] sm:$0xff]  ;;  %v205_v15 = vld [vmem:[%s1525_s30 + $0x230] sm:$0xff] }
  0x56   : > { %431 = vxpose.xlu1.b32.cont [9/16] %v152_v16, 128  ;;  %399 = vxpose.xlu0.b32.cont [9/16] %v151_v17, 128 }
  0x5a   : > { %432 = vxpose.xlu1.b32.cont [10/16] %v154_v18, 128  ;;  %400 = vxpose.xlu0.b32.cont [10/16] %v153_v19, 128  ;;  %v208_v18 = vld [vmem:[%s1525_s30 + $0x248] sm:$0xff]  ;;  %v207_v19 = vld [vmem:[%s1525_s30 + $0x240] sm:$0xff] }
  0x5e   : > { %433 = vxpose.xlu1.b32.cont [11/16] %v156_v20, 128  ;;  %401 = vxpose.xlu0.b32.cont [11/16] %v155_v21, 128 }
  0x62   : > { %434 = vxpose.xlu1.b32.cont [12/16] %v158_v22, 128  ;;  %402 = vxpose.xlu0.b32.cont [12/16] %v157_v23, 128  ;;  %v210_v22 = vld [vmem:[%s1525_s30 + $0x258] sm:$0xff]  ;;  %v209_v23 = vld [vmem:[%s1525_s30 + $0x250] sm:$0xff] }
  0x66   : > { %435 = vxpose.xlu1.b32.cont [13/16] %v160_v24, 128  ;;  %403 = vxpose.xlu0.b32.cont [13/16] %v159_v25, 128 }
  0x6a   : > { %436 = vxpose.xlu1.b32.cont [14/16] %v162_v26, 128  ;;  %404 = vxpose.xlu0.b32.cont [14/16] %v161_v27, 128  ;;  %v212_v26 = vld [vmem:[%s1525_s30 + $0x268] sm:$0xff]  ;;  %v211_v27 = vld [vmem:[%s1525_s30 + $0x260] sm:$0xff] }
  0x6e   : > { %437 = vxpose.xlu1.b32.cont [15/16] %v164_v28, 128  ;;  %405 = vxpose.xlu0.b32.cont [15/16] %v163_v29, 128 }
  0x72   : > { %438 = vxpose.xlu1.b32.end [16/16] %v166_v30, 128  ;;  %406 = vxpose.xlu0.b32.end [16/16] %v165_v31, 128  ;;  %v214_v30 = vld [vmem:[%s1525_s30 + $0x278] sm:$0xff]  ;;  %v213_v31 = vld [vmem:[%s1525_s30 + $0x270] sm:$0xff] }
  0x76   : > { %487 = vxpose.xlu1.b32.start [1/16] %v168_v32, 128  ;;  %455 = vxpose.xlu0.b32.start [1/16] %v167_v33, 128 }
  0x7a   : > { %488 = vxpose.xlu1.b32.cont [2/16] %v170_v34, 128  ;;  %456 = vxpose.xlu0.b32.cont [2/16] %v169_v35, 128  ;;  %v216_v34 = vld [vmem:[%s1525_s30 + $0x288] sm:$0xff]  ;;  %v215_v35 = vld [vmem:[%s1525_s30 + $0x280] sm:$0xff] }
  0x7e   : > { %489 = vxpose.xlu1.b32.cont [3/16] %v172_v36, 128  ;;  %457 = vxpose.xlu0.b32.cont [3/16] %v171_v37, 128 }
  0x82   : > { %490 = vxpose.xlu1.b32.cont [4/16] %v174_v38, 128  ;;  %458 = vxpose.xlu0.b32.cont [4/16] %v173_v39, 128  ;;  %v218_v38 = vld [vmem:[%s1525_s30 + $0x298] sm:$0xff]  ;;  %v217_v39 = vld [vmem:[%s1525_s30 + $0x290] sm:$0xff] }
  0x86   : > { %491 = vxpose.xlu1.b32.cont [5/16] %v176_v40, 128  ;;  %459 = vxpose.xlu0.b32.cont [5/16] %v175_v41, 128 }
  0x8a   : > { %492 = vxpose.xlu1.b32.cont [6/16] %v178_v42, 128  ;;  %460 = vxpose.xlu0.b32.cont [6/16] %v177_v43, 128  ;;  %v220_v42 = vld [vmem:[%s1525_s30 + $0x2a8] sm:$0xff]  ;;  %v219_v43 = vld [vmem:[%s1525_s30 + $0x2a0] sm:$0xff] }
  0x8e   : > { %493 = vxpose.xlu1.b32.cont [7/16] %v180_v44, 128  ;;  %461 = vxpose.xlu0.b32.cont [7/16] %v179_v45, 128 }
  0x92   : > { %494 = vxpose.xlu1.b32.cont [8/16] %v182_v46, 128  ;;  %462 = vxpose.xlu0.b32.cont [8/16] %v181_v47, 128  ;;  %v222_v46 = vld [vmem:[%s1525_s30 + $0x2b8] sm:$0xff]  ;;  %v221_v47 = vld [vmem:[%s1525_s30 + $0x2b0] sm:$0xff] }
  0x96   : > { %495 = vxpose.xlu1.b32.cont [9/16] %v184_v48, 128  ;;  %463 = vxpose.xlu0.b32.cont [9/16] %v183_v49, 128 }
  0x9a   : > { %496 = vxpose.xlu1.b32.cont [10/16] %v186_v50, 128  ;;  %464 = vxpose.xlu0.b32.cont [10/16] %v185_v51, 128  ;;  %v224_v50 = vld [vmem:[%s1525_s30 + $0x2c8] sm:$0xff]  ;;  %v223_v51 = vld [vmem:[%s1525_s30 + $0x2c0] sm:$0xff] }
  0x9e   : > { %497 = vxpose.xlu1.b32.cont [11/16] %v188_v52, 128  ;;  %465 = vxpose.xlu0.b32.cont [11/16] %v187_v53, 128 }
  0xa2   : > { %498 = vxpose.xlu1.b32.cont [12/16] %v190_v54, 128  ;;  %466 = vxpose.xlu0.b32.cont [12/16] %v189_v55, 128  ;;  %v226_v54 = vld [vmem:[%s1525_s30 + $0x2d8] sm:$0xff]  ;;  %v225_v55 = vld [vmem:[%s1525_s30 + $0x2d0] sm:$0xff] }
  0xa6   : > { %499 = vxpose.xlu1.b32.cont [13/16] %v192_v56, 128  ;;  %467 = vxpose.xlu0.b32.cont [13/16] %v191_v57, 128 }
  0xaa   : > { %500 = vxpose.xlu1.b32.cont [14/16] %v194_v58, 128  ;;  %468 = vxpose.xlu0.b32.cont [14/16] %v193_v59, 128  ;;  %v228_v58 = vld [vmem:[%s1525_s30 + $0x2e8] sm:$0xff]  ;;  %v227_v59 = vld [vmem:[%s1525_s30 + $0x2e0] sm:$0xff] }
  0xae   : > { %501 = vxpose.xlu1.b32.cont [15/16] %v196_v60, 128  ;;  %469 = vxpose.xlu0.b32.cont [15/16] %v195_v61, 128 }
  0xb2   : > { %502 = vxpose.xlu1.b32.end [16/16] %v198_v62, 128  ;;  %v439_v0 = vpop.trf.xlu1  ;;  %470 = vxpose.xlu0.b32.end [16/16] %v197_v63, 128  ;;  %v407_v1 = vpop.trf.xlu0  ;;  %v230_v62 = vld [vmem:[%s1525_s30 + $0x2f8] sm:$0xff]  ;;  %v229_v63 = vld [vmem:[%s1525_s30 + $0x2f0] sm:$0xff] }
  0xb3   : > { %1031 = vst [vmem:[%s1597_s17 + $0x400] sm:$0xff] %v439_v0  ;;  %903 = vst [vmem:[%s1597_s17] sm:$0xff] %v407_v1 }
  0xb6   : > { %551 = vxpose.xlu1.b32.start [1/16] %v200_v2, 128  ;;  %v440_v4 = vpop.trf.xlu1  ;;  %519 = vxpose.xlu0.b32.start [1/16] %v199_v3, 128  ;;  %v408_v5 = vpop.trf.xlu0  ;;  %v232_v2 = vld [vmem:[%s1525_s30 + $0x308] sm:$0xff]  ;;  %v231_v3 = vld [vmem:[%s1525_s30 + $0x300] sm:$0xff] }
  0xb7   : > { %1039 = vst [vmem:[%s1597_s17 + $0x440] sm:$0xff] %v440_v4  ;;  %911 = vst [vmem:[%s1597_s17 + $0x40] sm:$0xff] %v408_v5 }
  0xba   : > { %552 = vxpose.xlu1.b32.cont [2/16] %v202_v6, 128  ;;  %v441_v8 = vpop.trf.xlu1  ;;  %520 = vxpose.xlu0.b32.cont [2/16] %v201_v7, 128  ;;  %v409_v9 = vpop.trf.xlu0  ;;  %v234_v6 = vld [vmem:[%s1525_s30 + $0x318] sm:$0xff]  ;;  %v233_v7 = vld [vmem:[%s1525_s30 + $0x310] sm:$0xff] }
  0xbb   : > { %1047 = vst [vmem:[%s1597_s17 + $0x480] sm:$0xff] %v441_v8  ;;  %919 = vst [vmem:[%s1597_s17 + $0x80] sm:$0xff] %v409_v9 }
  0xbe   : > { %553 = vxpose.xlu1.b32.cont [3/16] %v204_v10, 128  ;;  %v442_v12 = vpop.trf.xlu1  ;;  %521 = vxpose.xlu0.b32.cont [3/16] %v203_v11, 128  ;;  %v410_v13 = vpop.trf.xlu0  ;;  %v236_v10 = vld [vmem:[%s1525_s30 + $0x328] sm:$0xff]  ;;  %v235_v11 = vld [vmem:[%s1525_s30 + $0x320] sm:$0xff] }
  0xbf   : > { %1055 = vst [vmem:[%s1597_s17 + $0x4c0] sm:$0xff] %v442_v12  ;;  %927 = vst [vmem:[%s1597_s17 + $0xc0] sm:$0xff] %v410_v13 }
  0xc2   : > { %554 = vxpose.xlu1.b32.cont [4/16] %v206_v14, 128  ;;  %v443_v16 = vpop.trf.xlu1  ;;  %522 = vxpose.xlu0.b32.cont [4/16] %v205_v15, 128  ;;  %v411_v17 = vpop.trf.xlu0  ;;  %v238_v14 = vld [vmem:[%s1525_s30 + $0x338] sm:$0xff]  ;;  %v237_v15 = vld [vmem:[%s1525_s30 + $0x330] sm:$0xff] }
  0xc3   : > { %1063 = vst [vmem:[%s1597_s17 + $0x500] sm:$0xff] %v443_v16  ;;  %935 = vst [vmem:[%s1597_s17 + $0x100] sm:$0xff] %v411_v17 }
  0xc6   : > { %555 = vxpose.xlu1.b32.cont [5/16] %v208_v18, 128  ;;  %v444_v20 = vpop.trf.xlu1  ;;  %523 = vxpose.xlu0.b32.cont [5/16] %v207_v19, 128  ;;  %v412_v21 = vpop.trf.xlu0  ;;  %v240_v18 = vld [vmem:[%s1525_s30 + $0x348] sm:$0xff]  ;;  %v239_v19 = vld [vmem:[%s1525_s30 + $0x340] sm:$0xff] }
  0xc7   : > { %1071 = vst [vmem:[%s1597_s17 + $0x540] sm:$0xff] %v444_v20  ;;  %943 = vst [vmem:[%s1597_s17 + $0x140] sm:$0xff] %v412_v21 }
  0xca   : > { %556 = vxpose.xlu1.b32.cont [6/16] %v210_v22, 128  ;;  %v445_v24 = vpop.trf.xlu1  ;;  %524 = vxpose.xlu0.b32.cont [6/16] %v209_v23, 128  ;;  %v413_v25 = vpop.trf.xlu0  ;;  %v242_v22 = vld [vmem:[%s1525_s30 + $0x358] sm:$0xff]  ;;  %v241_v23 = vld [vmem:[%s1525_s30 + $0x350] sm:$0xff] }
  0xcb   : > { %1079 = vst [vmem:[%s1597_s17 + $0x580] sm:$0xff] %v445_v24  ;;  %951 = vst [vmem:[%s1597_s17 + $0x180] sm:$0xff] %v413_v25 }
  0xce   : > { %557 = vxpose.xlu1.b32.cont [7/16] %v212_v26, 128  ;;  %v446_v28 = vpop.trf.xlu1  ;;  %525 = vxpose.xlu0.b32.cont [7/16] %v211_v27, 128  ;;  %v414_v29 = vpop.trf.xlu0  ;;  %v244_v26 = vld [vmem:[%s1525_s30 + $0x368] sm:$0xff]  ;;  %v243_v27 = vld [vmem:[%s1525_s30 + $0x360] sm:$0xff] }
  0xcf   : > { %1087 = vst [vmem:[%s1597_s17 + $0x5c0] sm:$0xff] %v446_v28  ;;  %959 = vst [vmem:[%s1597_s17 + $0x1c0] sm:$0xff] %v414_v29 }
  0xd2   : > { %558 = vxpose.xlu1.b32.cont [8/16] %v214_v30, 128  ;;  %v447_v32 = vpop.trf.xlu1  ;;  %526 = vxpose.xlu0.b32.cont [8/16] %v213_v31, 128  ;;  %v415_v33 = vpop.trf.xlu0  ;;  %v246_v30 = vld [vmem:[%s1525_s30 + $0x378] sm:$0xff]  ;;  %v245_v31 = vld [vmem:[%s1525_s30 + $0x370] sm:$0xff] }
  0xd3   : > { %1095 = vst [vmem:[%s1597_s17 + $0x600] sm:$0xff] %v447_v32  ;;  %967 = vst [vmem:[%s1597_s17 + $0x200] sm:$0xff] %v415_v33 }
  0xd6   : > { %559 = vxpose.xlu1.b32.cont [9/16] %v216_v34, 128  ;;  %v448_v36 = vpop.trf.xlu1  ;;  %527 = vxpose.xlu0.b32.cont [9/16] %v215_v35, 128  ;;  %v416_v37 = vpop.trf.xlu0  ;;  %v248_v34 = vld [vmem:[%s1525_s30 + $0x388] sm:$0xff]  ;;  %v247_v35 = vld [vmem:[%s1525_s30 + $0x380] sm:$0xff] }
  0xd7   : > { %1103 = vst [vmem:[%s1597_s17 + $0x640] sm:$0xff] %v448_v36  ;;  %975 = vst [vmem:[%s1597_s17 + $0x240] sm:$0xff] %v416_v37 }
  0xda   : > { %560 = vxpose.xlu1.b32.cont [10/16] %v218_v38, 128  ;;  %v449_v40 = vpop.trf.xlu1  ;;  %528 = vxpose.xlu0.b32.cont [10/16] %v217_v39, 128  ;;  %v417_v41 = vpop.trf.xlu0  ;;  %v250_v38 = vld [vmem:[%s1525_s30 + $0x398] sm:$0xff]  ;;  %v249_v39 = vld [vmem:[%s1525_s30 + $0x390] sm:$0xff] }
  0xdb   : > { %1111 = vst [vmem:[%s1597_s17 + $0x680] sm:$0xff] %v449_v40  ;;  %983 = vst [vmem:[%s1597_s17 + $0x280] sm:$0xff] %v417_v41 }
  0xde   : > { %561 = vxpose.xlu1.b32.cont [11/16] %v220_v42, 128  ;;  %v450_v44 = vpop.trf.xlu1  ;;  %529 = vxpose.xlu0.b32.cont [11/16] %v219_v43, 128  ;;  %v418_v45 = vpop.trf.xlu0  ;;  %v252_v42 = vld [vmem:[%s1525_s30 + $0x3a8] sm:$0xff]  ;;  %v251_v43 = vld [vmem:[%s1525_s30 + $0x3a0] sm:$0xff] }
  0xdf   : > { %1119 = vst [vmem:[%s1597_s17 + $0x6c0] sm:$0xff] %v450_v44  ;;  %991 = vst [vmem:[%s1597_s17 + $0x2c0] sm:$0xff] %v418_v45 }
  0xe2   : > { %562 = vxpose.xlu1.b32.cont [12/16] %v222_v46, 128  ;;  %v451_v48 = vpop.trf.xlu1  ;;  %530 = vxpose.xlu0.b32.cont [12/16] %v221_v47, 128  ;;  %v419_v49 = vpop.trf.xlu0  ;;  %v254_v46 = vld [vmem:[%s1525_s30 + $0x3b8] sm:$0xff]  ;;  %v253_v47 = vld [vmem:[%s1525_s30 + $0x3b0] sm:$0xff] }
  0xe3   : > { %1127 = vst [vmem:[%s1597_s17 + $0x700] sm:$0xff] %v451_v48  ;;  %999 = vst [vmem:[%s1597_s17 + $0x300] sm:$0xff] %v419_v49 }
  0xe6   : > { %563 = vxpose.xlu1.b32.cont [13/16] %v224_v50, 128  ;;  %v452_v52 = vpop.trf.xlu1  ;;  %531 = vxpose.xlu0.b32.cont [13/16] %v223_v51, 128  ;;  %v420_v53 = vpop.trf.xlu0  ;;  %v256_v50 = vld [vmem:[%s1525_s30 + $0x3c8] sm:$0xff]  ;;  %v255_v51 = vld [vmem:[%s1525_s30 + $0x3c0] sm:$0xff] }
  0xe7   : > { %1135 = vst [vmem:[%s1597_s17 + $0x740] sm:$0xff] %v452_v52  ;;  %1007 = vst [vmem:[%s1597_s17 + $0x340] sm:$0xff] %v420_v53 }
  0xea   : > { %564 = vxpose.xlu1.b32.cont [14/16] %v226_v54, 128  ;;  %v453_v56 = vpop.trf.xlu1  ;;  %532 = vxpose.xlu0.b32.cont [14/16] %v225_v55, 128  ;;  %v421_v57 = vpop.trf.xlu0  ;;  %v258_v54 = vld [vmem:[%s1525_s30 + $0x3d8] sm:$0xff]  ;;  %v257_v55 = vld [vmem:[%s1525_s30 + $0x3d0] sm:$0xff] }
  0xeb   : > { %1143 = vst [vmem:[%s1597_s17 + $0x780] sm:$0xff] %v453_v56  ;;  %1015 = vst [vmem:[%s1597_s17 + $0x380] sm:$0xff] %v421_v57 }
  0xee   : > { %565 = vxpose.xlu1.b32.cont [15/16] %v228_v58, 128  ;;  %v454_v60 = vpop.trf.xlu1  ;;  %533 = vxpose.xlu0.b32.cont [15/16] %v227_v59, 128  ;;  %v422_v61 = vpop.trf.xlu0  ;;  %v260_v58 = vld [vmem:[%s1525_s30 + $0x3e8] sm:$0xff]  ;;  %v259_v59 = vld [vmem:[%s1525_s30 + $0x3e0] sm:$0xff] }
  0xef   : > { %1151 = vst [vmem:[%s1597_s17 + $0x7c0] sm:$0xff] %v454_v60  ;;  %1023 = vst [vmem:[%s1597_s17 + $0x3c0] sm:$0xff] %v422_v61 }
  0xf2   : > { %566 = vxpose.xlu1.b32.end [16/16] %v230_v62, 128  ;;  %v503_v0 = vpop.trf.xlu1  ;;  %534 = vxpose.xlu0.b32.end [16/16] %v229_v63, 128  ;;  %v471_v1 = vpop.trf.xlu0  ;;  %v262_v62 = vld [vmem:[%s1525_s30 + $0x3f8] sm:$0xff]  ;;  %v261_v63 = vld [vmem:[%s1525_s30 + $0x3f0] sm:$0xff] }
  0xf3   : > { %1032 = vst [vmem:[%s1597_s17 + $0x408] sm:$0xff] %v503_v0  ;;  %904 = vst [vmem:[%s1597_s17 + $0x8] sm:$0xff] %v471_v1 }
  0xf6   : > { %615 = vxpose.xlu1.b32.start [1/16] %v232_v2, 128  ;;  %v504_v4 = vpop.trf.xlu1  ;;  %583 = vxpose.xlu0.b32.start [1/16] %v231_v3, 128  ;;  %v472_v5 = vpop.trf.xlu0  ;;  %v264_v2 = vld [vmem:[%s1525_s30 + $0x408] sm:$0xff]  ;;  %v263_v3 = vld [vmem:[%s1525_s30 + $0x400] sm:$0xff] }
  0xf7   : > { %1040 = vst [vmem:[%s1597_s17 + $0x448] sm:$0xff] %v504_v4  ;;  %912 = vst [vmem:[%s1597_s17 + $0x48] sm:$0xff] %v472_v5 }
  0xfa   : > { %616 = vxpose.xlu1.b32.cont [2/16] %v234_v6, 128  ;;  %v505_v8 = vpop.trf.xlu1  ;;  %584 = vxpose.xlu0.b32.cont [2/16] %v233_v7, 128  ;;  %v473_v9 = vpop.trf.xlu0  ;;  %v266_v6 = vld [vmem:[%s1525_s30 + $0x418] sm:$0xff]  ;;  %v265_v7 = vld [vmem:[%s1525_s30 + $0x410] sm:$0xff] }
  0xfb   : > { %1048 = vst [vmem:[%s1597_s17 + $0x488] sm:$0xff] %v505_v8  ;;  %920 = vst [vmem:[%s1597_s17 + $0x88] sm:$0xff] %v473_v9 }
  0xfe   : > { %617 = vxpose.xlu1.b32.cont [3/16] %v236_v10, 128  ;;  %v506_v12 = vpop.trf.xlu1  ;;  %585 = vxpose.xlu0.b32.cont [3/16] %v235_v11, 128  ;;  %v474_v13 = vpop.trf.xlu0  ;;  %v268_v10 = vld [vmem:[%s1525_s30 + $0x428] sm:$0xff]  ;;  %v267_v11 = vld [vmem:[%s1525_s30 + $0x420] sm:$0xff] }
  0xff   : > { %1056 = vst [vmem:[%s1597_s17 + $0x4c8] sm:$0xff] %v506_v12  ;;  %928 = vst [vmem:[%s1597_s17 + $0xc8] sm:$0xff] %v474_v13 }
 0x102   : > { %618 = vxpose.xlu1.b32.cont [4/16] %v238_v14, 128  ;;  %v507_v16 = vpop.trf.xlu1  ;;  %586 = vxpose.xlu0.b32.cont [4/16] %v237_v15, 128  ;;  %v475_v17 = vpop.trf.xlu0  ;;  %v270_v14 = vld [vmem:[%s1525_s30 + $0x438] sm:$0xff]  ;;  %v269_v15 = vld [vmem:[%s1525_s30 + $0x430] sm:$0xff] }
 0x103   : > { %1064 = vst [vmem:[%s1597_s17 + $0x508] sm:$0xff] %v507_v16  ;;  %936 = vst [vmem:[%s1597_s17 + $0x108] sm:$0xff] %v475_v17 }
 0x106   : > { %619 = vxpose.xlu1.b32.cont [5/16] %v240_v18, 128  ;;  %v508_v20 = vpop.trf.xlu1  ;;  %587 = vxpose.xlu0.b32.cont [5/16] %v239_v19, 128  ;;  %v476_v21 = vpop.trf.xlu0  ;;  %v272_v18 = vld [vmem:[%s1525_s30 + $0x448] sm:$0xff]  ;;  %v271_v19 = vld [vmem:[%s1525_s30 + $0x440] sm:$0xff] }
 0x107   : > { %1072 = vst [vmem:[%s1597_s17 + $0x548] sm:$0xff] %v508_v20  ;;  %944 = vst [vmem:[%s1597_s17 + $0x148] sm:$0xff] %v476_v21 }
 0x10a   : > { %620 = vxpose.xlu1.b32.cont [6/16] %v242_v22, 128  ;;  %v509_v24 = vpop.trf.xlu1  ;;  %588 = vxpose.xlu0.b32.cont [6/16] %v241_v23, 128  ;;  %v477_v25 = vpop.trf.xlu0  ;;  %v274_v22 = vld [vmem:[%s1525_s30 + $0x458] sm:$0xff]  ;;  %v273_v23 = vld [vmem:[%s1525_s30 + $0x450] sm:$0xff] }
 0x10b   : > { %1080 = vst [vmem:[%s1597_s17 + $0x588] sm:$0xff] %v509_v24  ;;  %952 = vst [vmem:[%s1597_s17 + $0x188] sm:$0xff] %v477_v25 }
 0x10e   : > { %621 = vxpose.xlu1.b32.cont [7/16] %v244_v26, 128  ;;  %v510_v28 = vpop.trf.xlu1  ;;  %589 = vxpose.xlu0.b32.cont [7/16] %v243_v27, 128  ;;  %v478_v29 = vpop.trf.xlu0  ;;  %v276_v26 = vld [vmem:[%s1525_s30 + $0x468] sm:$0xff]  ;;  %v275_v27 = vld [vmem:[%s1525_s30 + $0x460] sm:$0xff] }
 0x10f   : > { %1088 = vst [vmem:[%s1597_s17 + $0x5c8] sm:$0xff] %v510_v28  ;;  %960 = vst [vmem:[%s1597_s17 + $0x1c8] sm:$0xff] %v478_v29 }
 0x112   : > { %622 = vxpose.xlu1.b32.cont [8/16] %v246_v30, 128  ;;  %v511_v32 = vpop.trf.xlu1  ;;  %590 = vxpose.xlu0.b32.cont [8/16] %v245_v31, 128  ;;  %v479_v33 = vpop.trf.xlu0  ;;  %v278_v30 = vld [vmem:[%s1525_s30 + $0x478] sm:$0xff]  ;;  %v277_v31 = vld [vmem:[%s1525_s30 + $0x470] sm:$0xff] }
 0x113   : > { %1096 = vst [vmem:[%s1597_s17 + $0x608] sm:$0xff] %v511_v32  ;;  %968 = vst [vmem:[%s1597_s17 + $0x208] sm:$0xff] %v479_v33 }
 0x116   : > { %623 = vxpose.xlu1.b32.cont [9/16] %v248_v34, 128  ;;  %v512_v36 = vpop.trf.xlu1  ;;  %591 = vxpose.xlu0.b32.cont [9/16] %v247_v35, 128  ;;  %v480_v37 = vpop.trf.xlu0  ;;  %v280_v34 = vld [vmem:[%s1525_s30 + $0x488] sm:$0xff]  ;;  %v279_v35 = vld [vmem:[%s1525_s30 + $0x480] sm:$0xff] }
 0x117   : > { %1104 = vst [vmem:[%s1597_s17 + $0x648] sm:$0xff] %v512_v36  ;;  %976 = vst [vmem:[%s1597_s17 + $0x248] sm:$0xff] %v480_v37 }
 0x11a   : > { %624 = vxpose.xlu1.b32.cont [10/16] %v250_v38, 128  ;;  %v513_v40 = vpop.trf.xlu1  ;;  %592 = vxpose.xlu0.b32.cont [10/16] %v249_v39, 128  ;;  %v481_v41 = vpop.trf.xlu0  ;;  %v282_v38 = vld [vmem:[%s1525_s30 + $0x498] sm:$0xff]  ;;  %v281_v39 = vld [vmem:[%s1525_s30 + $0x490] sm:$0xff] }
 0x11b   : > { %1112 = vst [vmem:[%s1597_s17 + $0x688] sm:$0xff] %v513_v40  ;;  %984 = vst [vmem:[%s1597_s17 + $0x288] sm:$0xff] %v481_v41 }
 0x11e   : > { %625 = vxpose.xlu1.b32.cont [11/16] %v252_v42, 128  ;;  %v514_v44 = vpop.trf.xlu1  ;;  %593 = vxpose.xlu0.b32.cont [11/16] %v251_v43, 128  ;;  %v482_v45 = vpop.trf.xlu0  ;;  %v284_v42 = vld [vmem:[%s1525_s30 + $0x4a8] sm:$0xff]  ;;  %v283_v43 = vld [vmem:[%s1525_s30 + $0x4a0] sm:$0xff] }
 0x11f   : > { %1120 = vst [vmem:[%s1597_s17 + $0x6c8] sm:$0xff] %v514_v44  ;;  %992 = vst [vmem:[%s1597_s17 + $0x2c8] sm:$0xff] %v482_v45 }
 0x122   : > { %626 = vxpose.xlu1.b32.cont [12/16] %v254_v46, 128  ;;  %v515_v48 = vpop.trf.xlu1  ;;  %594 = vxpose.xlu0.b32.cont [12/16] %v253_v47, 128  ;;  %v483_v49 = vpop.trf.xlu0  ;;  %v286_v46 = vld [vmem:[%s1525_s30 + $0x4b8] sm:$0xff]  ;;  %v285_v47 = vld [vmem:[%s1525_s30 + $0x4b0] sm:$0xff] }
 0x123   : > { %1128 = vst [vmem:[%s1597_s17 + $0x708] sm:$0xff] %v515_v48  ;;  %1000 = vst [vmem:[%s1597_s17 + $0x308] sm:$0xff] %v483_v49 }
 0x126   : > { %627 = vxpose.xlu1.b32.cont [13/16] %v256_v50, 128  ;;  %v516_v52 = vpop.trf.xlu1  ;;  %595 = vxpose.xlu0.b32.cont [13/16] %v255_v51, 128  ;;  %v484_v53 = vpop.trf.xlu0  ;;  %v288_v50 = vld [vmem:[%s1525_s30 + $0x4c8] sm:$0xff]  ;;  %v287_v51 = vld [vmem:[%s1525_s30 + $0x4c0] sm:$0xff] }
 0x127   : > { %1136 = vst [vmem:[%s1597_s17 + $0x748] sm:$0xff] %v516_v52  ;;  %1008 = vst [vmem:[%s1597_s17 + $0x348] sm:$0xff] %v484_v53 }
 0x12a   : > { %628 = vxpose.xlu1.b32.cont [14/16] %v258_v54, 128  ;;  %v517_v56 = vpop.trf.xlu1  ;;  %596 = vxpose.xlu0.b32.cont [14/16] %v257_v55, 128  ;;  %v485_v57 = vpop.trf.xlu0  ;;  %v290_v54 = vld [vmem:[%s1525_s30 + $0x4d8] sm:$0xff]  ;;  %v289_v55 = vld [vmem:[%s1525_s30 + $0x4d0] sm:$0xff] }
 0x12b   : > { %1144 = vst [vmem:[%s1597_s17 + $0x788] sm:$0xff] %v517_v56  ;;  %1016 = vst [vmem:[%s1597_s17 + $0x388] sm:$0xff] %v485_v57 }
 0x12e   : > { %629 = vxpose.xlu1.b32.cont [15/16] %v260_v58, 128  ;;  %v518_v60 = vpop.trf.xlu1  ;;  %597 = vxpose.xlu0.b32.cont [15/16] %v259_v59, 128  ;;  %v486_v61 = vpop.trf.xlu0  ;;  %v292_v58 = vld [vmem:[%s1525_s30 + $0x4e8] sm:$0xff]  ;;  %v291_v59 = vld [vmem:[%s1525_s30 + $0x4e0] sm:$0xff] }
 0x12f   : > { %1152 = vst [vmem:[%s1597_s17 + $0x7c8] sm:$0xff] %v518_v60  ;;  %1024 = vst [vmem:[%s1597_s17 + $0x3c8] sm:$0xff] %v486_v61 }
 0x132   : > { %630 = vxpose.xlu1.b32.end [16/16] %v262_v62, 128  ;;  %v567_v0 = vpop.trf.xlu1  ;;  %598 = vxpose.xlu0.b32.end [16/16] %v261_v63, 128  ;;  %v535_v1 = vpop.trf.xlu0  ;;  %v294_v62 = vld [vmem:[%s1525_s30 + $0x4f8] sm:$0xff]  ;;  %v293_v63 = vld [vmem:[%s1525_s30 + $0x4f0] sm:$0xff] }
 0x133   : > { %1033 = vst [vmem:[%s1597_s17 + $0x410] sm:$0xff] %v567_v0  ;;  %905 = vst [vmem:[%s1597_s17 + $0x10] sm:$0xff] %v535_v1 }
 0x136   : > { %679 = vxpose.xlu1.b32.start [1/16] %v264_v2, 128  ;;  %v568_v4 = vpop.trf.xlu1  ;;  %647 = vxpose.xlu0.b32.start [1/16] %v263_v3, 128  ;;  %v536_v5 = vpop.trf.xlu0  ;;  %v296_v2 = vld [vmem:[%s1525_s30 + $0x508] sm:$0xff]  ;;  %v295_v3 = vld [vmem:[%s1525_s30 + $0x500] sm:$0xff] }
 0x137   : > { %1041 = vst [vmem:[%s1597_s17 + $0x450] sm:$0xff] %v568_v4  ;;  %913 = vst [vmem:[%s1597_s17 + $0x50] sm:$0xff] %v536_v5 }
 0x13a   : > { %680 = vxpose.xlu1.b32.cont [2/16] %v266_v6, 128  ;;  %v569_v8 = vpop.trf.xlu1  ;;  %648 = vxpose.xlu0.b32.cont [2/16] %v265_v7, 128  ;;  %v537_v9 = vpop.trf.xlu0  ;;  %v298_v6 = vld [vmem:[%s1525_s30 + $0x518] sm:$0xff]  ;;  %v297_v7 = vld [vmem:[%s1525_s30 + $0x510] sm:$0xff] }
 0x13b   : > { %1049 = vst [vmem:[%s1597_s17 + $0x490] sm:$0xff] %v569_v8  ;;  %921 = vst [vmem:[%s1597_s17 + $0x90] sm:$0xff] %v537_v9 }
 0x13e   : > { %681 = vxpose.xlu1.b32.cont [3/16] %v268_v10, 128  ;;  %v570_v12 = vpop.trf.xlu1  ;;  %649 = vxpose.xlu0.b32.cont [3/16] %v267_v11, 128  ;;  %v538_v13 = vpop.trf.xlu0  ;;  %v300_v10 = vld [vmem:[%s1525_s30 + $0x528] sm:$0xff]  ;;  %v299_v11 = vld [vmem:[%s1525_s30 + $0x520] sm:$0xff] }
 0x13f   : > { %1057 = vst [vmem:[%s1597_s17 + $0x4d0] sm:$0xff] %v570_v12  ;;  %929 = vst [vmem:[%s1597_s17 + $0xd0] sm:$0xff] %v538_v13 }
 0x142   : > { %682 = vxpose.xlu1.b32.cont [4/16] %v270_v14, 128  ;;  %v571_v16 = vpop.trf.xlu1  ;;  %650 = vxpose.xlu0.b32.cont [4/16] %v269_v15, 128  ;;  %v539_v17 = vpop.trf.xlu0  ;;  %v302_v14 = vld [vmem:[%s1525_s30 + $0x538] sm:$0xff]  ;;  %v301_v15 = vld [vmem:[%s1525_s30 + $0x530] sm:$0xff] }
 0x143   : > { %1065 = vst [vmem:[%s1597_s17 + $0x510] sm:$0xff] %v571_v16  ;;  %937 = vst [vmem:[%s1597_s17 + $0x110] sm:$0xff] %v539_v17 }
 0x146   : > { %683 = vxpose.xlu1.b32.cont [5/16] %v272_v18, 128  ;;  %v572_v20 = vpop.trf.xlu1  ;;  %651 = vxpose.xlu0.b32.cont [5/16] %v271_v19, 128  ;;  %v540_v21 = vpop.trf.xlu0  ;;  %v304_v18 = vld [vmem:[%s1525_s30 + $0x548] sm:$0xff]  ;;  %v303_v19 = vld [vmem:[%s1525_s30 + $0x540] sm:$0xff] }
 0x147   : > { %1073 = vst [vmem:[%s1597_s17 + $0x550] sm:$0xff] %v572_v20  ;;  %945 = vst [vmem:[%s1597_s17 + $0x150] sm:$0xff] %v540_v21 }
 0x14a   : > { %684 = vxpose.xlu1.b32.cont [6/16] %v274_v22, 128  ;;  %v573_v24 = vpop.trf.xlu1  ;;  %652 = vxpose.xlu0.b32.cont [6/16] %v273_v23, 128  ;;  %v541_v25 = vpop.trf.xlu0  ;;  %v306_v22 = vld [vmem:[%s1525_s30 + $0x558] sm:$0xff]  ;;  %v305_v23 = vld [vmem:[%s1525_s30 + $0x550] sm:$0xff] }
 0x14b   : > { %1081 = vst [vmem:[%s1597_s17 + $0x590] sm:$0xff] %v573_v24  ;;  %953 = vst [vmem:[%s1597_s17 + $0x190] sm:$0xff] %v541_v25 }
 0x14e   : > { %685 = vxpose.xlu1.b32.cont [7/16] %v276_v26, 128  ;;  %v574_v28 = vpop.trf.xlu1  ;;  %653 = vxpose.xlu0.b32.cont [7/16] %v275_v27, 128  ;;  %v542_v29 = vpop.trf.xlu0  ;;  %v308_v26 = vld [vmem:[%s1525_s30 + $0x568] sm:$0xff]  ;;  %v307_v27 = vld [vmem:[%s1525_s30 + $0x560] sm:$0xff] }
 0x14f   : > { %1089 = vst [vmem:[%s1597_s17 + $0x5d0] sm:$0xff] %v574_v28  ;;  %961 = vst [vmem:[%s1597_s17 + $0x1d0] sm:$0xff] %v542_v29 }
 0x152   : > { %686 = vxpose.xlu1.b32.cont [8/16] %v278_v30, 128  ;;  %v575_v32 = vpop.trf.xlu1  ;;  %654 = vxpose.xlu0.b32.cont [8/16] %v277_v31, 128  ;;  %v543_v33 = vpop.trf.xlu0  ;;  %v310_v30 = vld [vmem:[%s1525_s30 + $0x578] sm:$0xff]  ;;  %v309_v31 = vld [vmem:[%s1525_s30 + $0x570] sm:$0xff] }
 0x153   : > { %1097 = vst [vmem:[%s1597_s17 + $0x610] sm:$0xff] %v575_v32  ;;  %969 = vst [vmem:[%s1597_s17 + $0x210] sm:$0xff] %v543_v33 }
 0x156   : > { %687 = vxpose.xlu1.b32.cont [9/16] %v280_v34, 128  ;;  %v576_v36 = vpop.trf.xlu1  ;;  %655 = vxpose.xlu0.b32.cont [9/16] %v279_v35, 128  ;;  %v544_v37 = vpop.trf.xlu0  ;;  %v312_v34 = vld [vmem:[%s1525_s30 + $0x588] sm:$0xff]  ;;  %v311_v35 = vld [vmem:[%s1525_s30 + $0x580] sm:$0xff] }
 0x157   : > { %1105 = vst [vmem:[%s1597_s17 + $0x650] sm:$0xff] %v576_v36  ;;  %977 = vst [vmem:[%s1597_s17 + $0x250] sm:$0xff] %v544_v37 }
 0x15a   : > { %688 = vxpose.xlu1.b32.cont [10/16] %v282_v38, 128  ;;  %v577_v40 = vpop.trf.xlu1  ;;  %656 = vxpose.xlu0.b32.cont [10/16] %v281_v39, 128  ;;  %v545_v41 = vpop.trf.xlu0  ;;  %v314_v38 = vld [vmem:[%s1525_s30 + $0x598] sm:$0xff]  ;;  %v313_v39 = vld [vmem:[%s1525_s30 + $0x590] sm:$0xff] }
 0x15b   : > { %1113 = vst [vmem:[%s1597_s17 + $0x690] sm:$0xff] %v577_v40  ;;  %985 = vst [vmem:[%s1597_s17 + $0x290] sm:$0xff] %v545_v41 }
 0x15e   : > { %689 = vxpose.xlu1.b32.cont [11/16] %v284_v42, 128  ;;  %v578_v44 = vpop.trf.xlu1  ;;  %657 = vxpose.xlu0.b32.cont [11/16] %v283_v43, 128  ;;  %v546_v45 = vpop.trf.xlu0  ;;  %v316_v42 = vld [vmem:[%s1525_s30 + $0x5a8] sm:$0xff]  ;;  %v315_v43 = vld [vmem:[%s1525_s30 + $0x5a0] sm:$0xff] }
 0x15f   : > { %1121 = vst [vmem:[%s1597_s17 + $0x6d0] sm:$0xff] %v578_v44  ;;  %993 = vst [vmem:[%s1597_s17 + $0x2d0] sm:$0xff] %v546_v45 }
 0x162   : > { %690 = vxpose.xlu1.b32.cont [12/16] %v286_v46, 128  ;;  %v579_v48 = vpop.trf.xlu1  ;;  %658 = vxpose.xlu0.b32.cont [12/16] %v285_v47, 128  ;;  %v547_v49 = vpop.trf.xlu0  ;;  %v318_v46 = vld [vmem:[%s1525_s30 + $0x5b8] sm:$0xff]  ;;  %v317_v47 = vld [vmem:[%s1525_s30 + $0x5b0] sm:$0xff] }
 0x163   : > { %1129 = vst [vmem:[%s1597_s17 + $0x710] sm:$0xff] %v579_v48  ;;  %1001 = vst [vmem:[%s1597_s17 + $0x310] sm:$0xff] %v547_v49 }
 0x166   : > { %691 = vxpose.xlu1.b32.cont [13/16] %v288_v50, 128  ;;  %v580_v52 = vpop.trf.xlu1  ;;  %659 = vxpose.xlu0.b32.cont [13/16] %v287_v51, 128  ;;  %v548_v53 = vpop.trf.xlu0  ;;  %v320_v50 = vld [vmem:[%s1525_s30 + $0x5c8] sm:$0xff]  ;;  %v319_v51 = vld [vmem:[%s1525_s30 + $0x5c0] sm:$0xff] }
 0x167   : > { %1137 = vst [vmem:[%s1597_s17 + $0x750] sm:$0xff] %v580_v52  ;;  %1009 = vst [vmem:[%s1597_s17 + $0x350] sm:$0xff] %v548_v53 }
 0x16a   : > { %692 = vxpose.xlu1.b32.cont [14/16] %v290_v54, 128  ;;  %v581_v56 = vpop.trf.xlu1  ;;  %660 = vxpose.xlu0.b32.cont [14/16] %v289_v55, 128  ;;  %v549_v57 = vpop.trf.xlu0  ;;  %v322_v54 = vld [vmem:[%s1525_s30 + $0x5d8] sm:$0xff]  ;;  %v321_v55 = vld [vmem:[%s1525_s30 + $0x5d0] sm:$0xff] }
 0x16b   : > { %1145 = vst [vmem:[%s1597_s17 + $0x790] sm:$0xff] %v581_v56  ;;  %1017 = vst [vmem:[%s1597_s17 + $0x390] sm:$0xff] %v549_v57 }
 0x16e   : > { %693 = vxpose.xlu1.b32.cont [15/16] %v292_v58, 128  ;;  %v582_v60 = vpop.trf.xlu1  ;;  %661 = vxpose.xlu0.b32.cont [15/16] %v291_v59, 128  ;;  %v550_v61 = vpop.trf.xlu0  ;;  %v324_v58 = vld [vmem:[%s1525_s30 + $0x5e8] sm:$0xff]  ;;  %v323_v59 = vld [vmem:[%s1525_s30 + $0x5e0] sm:$0xff] }
 0x16f   : > { %1153 = vst [vmem:[%s1597_s17 + $0x7d0] sm:$0xff] %v582_v60  ;;  %1025 = vst [vmem:[%s1597_s17 + $0x3d0] sm:$0xff] %v550_v61 }
 0x172   : > { %694 = vxpose.xlu1.b32.end [16/16] %v294_v62, 128  ;;  %v631_v0 = vpop.trf.xlu1  ;;  %662 = vxpose.xlu0.b32.end [16/16] %v293_v63, 128  ;;  %v599_v1 = vpop.trf.xlu0  ;;  %v326_v62 = vld [vmem:[%s1525_s30 + $0x5f8] sm:$0xff]  ;;  %v325_v63 = vld [vmem:[%s1525_s30 + $0x5f0] sm:$0xff] }
 0x173   : > { %1034 = vst [vmem:[%s1597_s17 + $0x418] sm:$0xff] %v631_v0  ;;  %906 = vst [vmem:[%s1597_s17 + $0x18] sm:$0xff] %v599_v1 }
 0x176   : > { %743 = vxpose.xlu1.b32.start [1/16] %v296_v2, 128  ;;  %v632_v4 = vpop.trf.xlu1  ;;  %711 = vxpose.xlu0.b32.start [1/16] %v295_v3, 128  ;;  %v600_v5 = vpop.trf.xlu0  ;;  %v328_v2 = vld [vmem:[%s1525_s30 + $0x608] sm:$0xff]  ;;  %v327_v3 = vld [vmem:[%s1525_s30 + $0x600] sm:$0xff] }
 0x177   : > { %1042 = vst [vmem:[%s1597_s17 + $0x458] sm:$0xff] %v632_v4  ;;  %914 = vst [vmem:[%s1597_s17 + $0x58] sm:$0xff] %v600_v5 }
 0x17a   : > { %744 = vxpose.xlu1.b32.cont [2/16] %v298_v6, 128  ;;  %v633_v8 = vpop.trf.xlu1  ;;  %712 = vxpose.xlu0.b32.cont [2/16] %v297_v7, 128  ;;  %v601_v9 = vpop.trf.xlu0  ;;  %v330_v6 = vld [vmem:[%s1525_s30 + $0x618] sm:$0xff]  ;;  %v329_v7 = vld [vmem:[%s1525_s30 + $0x610] sm:$0xff] }
 0x17b   : > { %1050 = vst [vmem:[%s1597_s17 + $0x498] sm:$0xff] %v633_v8  ;;  %922 = vst [vmem:[%s1597_s17 + $0x98] sm:$0xff] %v601_v9 }
 0x17e   : > { %745 = vxpose.xlu1.b32.cont [3/16] %v300_v10, 128  ;;  %v634_v12 = vpop.trf.xlu1  ;;  %713 = vxpose.xlu0.b32.cont [3/16] %v299_v11, 128  ;;  %v602_v13 = vpop.trf.xlu0  ;;  %v332_v10 = vld [vmem:[%s1525_s30 + $0x628] sm:$0xff]  ;;  %v331_v11 = vld [vmem:[%s1525_s30 + $0x620] sm:$0xff] }
 0x17f   : > { %1058 = vst [vmem:[%s1597_s17 + $0x4d8] sm:$0xff] %v634_v12  ;;  %930 = vst [vmem:[%s1597_s17 + $0xd8] sm:$0xff] %v602_v13 }
 0x182   : > { %746 = vxpose.xlu1.b32.cont [4/16] %v302_v14, 128  ;;  %v635_v16 = vpop.trf.xlu1  ;;  %714 = vxpose.xlu0.b32.cont [4/16] %v301_v15, 128  ;;  %v603_v17 = vpop.trf.xlu0  ;;  %v334_v14 = vld [vmem:[%s1525_s30 + $0x638] sm:$0xff]  ;;  %v333_v15 = vld [vmem:[%s1525_s30 + $0x630] sm:$0xff] }
 0x183   : > { %1066 = vst [vmem:[%s1597_s17 + $0x518] sm:$0xff] %v635_v16  ;;  %938 = vst [vmem:[%s1597_s17 + $0x118] sm:$0xff] %v603_v17 }
 0x186   : > { %747 = vxpose.xlu1.b32.cont [5/16] %v304_v18, 128  ;;  %v636_v20 = vpop.trf.xlu1  ;;  %715 = vxpose.xlu0.b32.cont [5/16] %v303_v19, 128  ;;  %v604_v21 = vpop.trf.xlu0  ;;  %v336_v18 = vld [vmem:[%s1525_s30 + $0x648] sm:$0xff]  ;;  %v335_v19 = vld [vmem:[%s1525_s30 + $0x640] sm:$0xff] }
 0x187   : > { %1074 = vst [vmem:[%s1597_s17 + $0x558] sm:$0xff] %v636_v20  ;;  %946 = vst [vmem:[%s1597_s17 + $0x158] sm:$0xff] %v604_v21 }
 0x18a   : > { %748 = vxpose.xlu1.b32.cont [6/16] %v306_v22, 128  ;;  %v637_v24 = vpop.trf.xlu1  ;;  %716 = vxpose.xlu0.b32.cont [6/16] %v305_v23, 128  ;;  %v605_v25 = vpop.trf.xlu0  ;;  %v338_v22 = vld [vmem:[%s1525_s30 + $0x658] sm:$0xff]  ;;  %v337_v23 = vld [vmem:[%s1525_s30 + $0x650] sm:$0xff] }
 0x18b   : > { %1082 = vst [vmem:[%s1597_s17 + $0x598] sm:$0xff] %v637_v24  ;;  %954 = vst [vmem:[%s1597_s17 + $0x198] sm:$0xff] %v605_v25 }
 0x18e   : > { %749 = vxpose.xlu1.b32.cont [7/16] %v308_v26, 128  ;;  %v638_v28 = vpop.trf.xlu1  ;;  %717 = vxpose.xlu0.b32.cont [7/16] %v307_v27, 128  ;;  %v606_v29 = vpop.trf.xlu0  ;;  %v340_v26 = vld [vmem:[%s1525_s30 + $0x668] sm:$0xff]  ;;  %v339_v27 = vld [vmem:[%s1525_s30 + $0x660] sm:$0xff] }
 0x18f   : > { %1090 = vst [vmem:[%s1597_s17 + $0x5d8] sm:$0xff] %v638_v28  ;;  %962 = vst [vmem:[%s1597_s17 + $0x1d8] sm:$0xff] %v606_v29 }
 0x192   : > { %750 = vxpose.xlu1.b32.cont [8/16] %v310_v30, 128  ;;  %v639_v32 = vpop.trf.xlu1  ;;  %718 = vxpose.xlu0.b32.cont [8/16] %v309_v31, 128  ;;  %v607_v33 = vpop.trf.xlu0  ;;  %v342_v30 = vld [vmem:[%s1525_s30 + $0x678] sm:$0xff]  ;;  %v341_v31 = vld [vmem:[%s1525_s30 + $0x670] sm:$0xff] }
 0x193   : > { %1098 = vst [vmem:[%s1597_s17 + $0x618] sm:$0xff] %v639_v32  ;;  %970 = vst [vmem:[%s1597_s17 + $0x218] sm:$0xff] %v607_v33 }
 0x196   : > { %751 = vxpose.xlu1.b32.cont [9/16] %v312_v34, 128  ;;  %v640_v36 = vpop.trf.xlu1  ;;  %719 = vxpose.xlu0.b32.cont [9/16] %v311_v35, 128  ;;  %v608_v37 = vpop.trf.xlu0  ;;  %v344_v34 = vld [vmem:[%s1525_s30 + $0x688] sm:$0xff]  ;;  %v343_v35 = vld [vmem:[%s1525_s30 + $0x680] sm:$0xff] }
 0x197   : > { %1106 = vst [vmem:[%s1597_s17 + $0x658] sm:$0xff] %v640_v36  ;;  %978 = vst [vmem:[%s1597_s17 + $0x258] sm:$0xff] %v608_v37 }
 0x19a   : > { %752 = vxpose.xlu1.b32.cont [10/16] %v314_v38, 128  ;;  %v641_v40 = vpop.trf.xlu1  ;;  %720 = vxpose.xlu0.b32.cont [10/16] %v313_v39, 128  ;;  %v609_v41 = vpop.trf.xlu0  ;;  %v346_v38 = vld [vmem:[%s1525_s30 + $0x698] sm:$0xff]  ;;  %v345_v39 = vld [vmem:[%s1525_s30 + $0x690] sm:$0xff] }
 0x19b   : > { %1114 = vst [vmem:[%s1597_s17 + $0x698] sm:$0xff] %v641_v40  ;;  %986 = vst [vmem:[%s1597_s17 + $0x298] sm:$0xff] %v609_v41 }
 0x19e   : > { %753 = vxpose.xlu1.b32.cont [11/16] %v316_v42, 128  ;;  %v642_v44 = vpop.trf.xlu1  ;;  %721 = vxpose.xlu0.b32.cont [11/16] %v315_v43, 128  ;;  %v610_v45 = vpop.trf.xlu0  ;;  %v348_v42 = vld [vmem:[%s1525_s30 + $0x6a8] sm:$0xff]  ;;  %v347_v43 = vld [vmem:[%s1525_s30 + $0x6a0] sm:$0xff] }
 0x19f   : > { %1122 = vst [vmem:[%s1597_s17 + $0x6d8] sm:$0xff] %v642_v44  ;;  %994 = vst [vmem:[%s1597_s17 + $0x2d8] sm:$0xff] %v610_v45 }
 0x1a2   : > { %754 = vxpose.xlu1.b32.cont [12/16] %v318_v46, 128  ;;  %v643_v48 = vpop.trf.xlu1  ;;  %722 = vxpose.xlu0.b32.cont [12/16] %v317_v47, 128  ;;  %v611_v49 = vpop.trf.xlu0  ;;  %v350_v46 = vld [vmem:[%s1525_s30 + $0x6b8] sm:$0xff]  ;;  %v349_v47 = vld [vmem:[%s1525_s30 + $0x6b0] sm:$0xff] }
 0x1a3   : > { %1130 = vst [vmem:[%s1597_s17 + $0x718] sm:$0xff] %v643_v48  ;;  %1002 = vst [vmem:[%s1597_s17 + $0x318] sm:$0xff] %v611_v49 }
 0x1a6   : > { %755 = vxpose.xlu1.b32.cont [13/16] %v320_v50, 128  ;;  %v644_v52 = vpop.trf.xlu1  ;;  %723 = vxpose.xlu0.b32.cont [13/16] %v319_v51, 128  ;;  %v612_v53 = vpop.trf.xlu0  ;;  %v352_v50 = vld [vmem:[%s1525_s30 + $0x6c8] sm:$0xff]  ;;  %v351_v51 = vld [vmem:[%s1525_s30 + $0x6c0] sm:$0xff] }
 0x1a7   : > { %1138 = vst [vmem:[%s1597_s17 + $0x758] sm:$0xff] %v644_v52  ;;  %1010 = vst [vmem:[%s1597_s17 + $0x358] sm:$0xff] %v612_v53 }
 0x1aa   : > { %756 = vxpose.xlu1.b32.cont [14/16] %v322_v54, 128  ;;  %v645_v56 = vpop.trf.xlu1  ;;  %724 = vxpose.xlu0.b32.cont [14/16] %v321_v55, 128  ;;  %v613_v57 = vpop.trf.xlu0  ;;  %v354_v54 = vld [vmem:[%s1525_s30 + $0x6d8] sm:$0xff]  ;;  %v353_v55 = vld [vmem:[%s1525_s30 + $0x6d0] sm:$0xff] }
 0x1ab   : > { %1146 = vst [vmem:[%s1597_s17 + $0x798] sm:$0xff] %v645_v56  ;;  %1018 = vst [vmem:[%s1597_s17 + $0x398] sm:$0xff] %v613_v57 }
 0x1ae   : > { %757 = vxpose.xlu1.b32.cont [15/16] %v324_v58, 128  ;;  %v646_v60 = vpop.trf.xlu1  ;;  %725 = vxpose.xlu0.b32.cont [15/16] %v323_v59, 128  ;;  %v614_v61 = vpop.trf.xlu0  ;;  %v356_v58 = vld [vmem:[%s1525_s30 + $0x6e8] sm:$0xff]  ;;  %v355_v59 = vld [vmem:[%s1525_s30 + $0x6e0] sm:$0xff] }
 0x1af   : > { %1154 = vst [vmem:[%s1597_s17 + $0x7d8] sm:$0xff] %v646_v60  ;;  %1026 = vst [vmem:[%s1597_s17 + $0x3d8] sm:$0xff] %v614_v61 }
 0x1b2   : > { %758 = vxpose.xlu1.b32.end [16/16] %v326_v62, 128  ;;  %v695_v0 = vpop.trf.xlu1  ;;  %726 = vxpose.xlu0.b32.end [16/16] %v325_v63, 128  ;;  %v663_v1 = vpop.trf.xlu0  ;;  %v358_v62 = vld [vmem:[%s1525_s30 + $0x6f8] sm:$0xff]  ;;  %v357_v63 = vld [vmem:[%s1525_s30 + $0x6f0] sm:$0xff] }
 0x1b3   : > { %1035 = vst [vmem:[%s1597_s17 + $0x420] sm:$0xff] %v695_v0  ;;  %907 = vst [vmem:[%s1597_s17 + $0x20] sm:$0xff] %v663_v1 }
 0x1b6   : > { %807 = vxpose.xlu1.b32.start [1/16] %v328_v2, 128  ;;  %v696_v4 = vpop.trf.xlu1  ;;  %775 = vxpose.xlu0.b32.start [1/16] %v327_v3, 128  ;;  %v664_v5 = vpop.trf.xlu0  ;;  %v360_v2 = vld [vmem:[%s1525_s30 + $0x708] sm:$0xff]  ;;  %v359_v3 = vld [vmem:[%s1525_s30 + $0x700] sm:$0xff] }
 0x1b7   : > { %1043 = vst [vmem:[%s1597_s17 + $0x460] sm:$0xff] %v696_v4  ;;  %915 = vst [vmem:[%s1597_s17 + $0x60] sm:$0xff] %v664_v5 }
 0x1ba   : > { %808 = vxpose.xlu1.b32.cont [2/16] %v330_v6, 128  ;;  %v697_v8 = vpop.trf.xlu1  ;;  %776 = vxpose.xlu0.b32.cont [2/16] %v329_v7, 128  ;;  %v665_v9 = vpop.trf.xlu0  ;;  %v362_v6 = vld [vmem:[%s1525_s30 + $0x718] sm:$0xff]  ;;  %v361_v7 = vld [vmem:[%s1525_s30 + $0x710] sm:$0xff] }
 0x1bb   : > { %1051 = vst [vmem:[%s1597_s17 + $0x4a0] sm:$0xff] %v697_v8  ;;  %923 = vst [vmem:[%s1597_s17 + $0xa0] sm:$0xff] %v665_v9 }
 0x1be   : > { %809 = vxpose.xlu1.b32.cont [3/16] %v332_v10, 128  ;;  %v698_v12 = vpop.trf.xlu1  ;;  %777 = vxpose.xlu0.b32.cont [3/16] %v331_v11, 128  ;;  %v666_v13 = vpop.trf.xlu0  ;;  %v364_v10 = vld [vmem:[%s1525_s30 + $0x728] sm:$0xff]  ;;  %v363_v11 = vld [vmem:[%s1525_s30 + $0x720] sm:$0xff] }
 0x1bf   : > { %1059 = vst [vmem:[%s1597_s17 + $0x4e0] sm:$0xff] %v698_v12  ;;  %931 = vst [vmem:[%s1597_s17 + $0xe0] sm:$0xff] %v666_v13 }
 0x1c2   : > { %810 = vxpose.xlu1.b32.cont [4/16] %v334_v14, 128  ;;  %v699_v16 = vpop.trf.xlu1  ;;  %778 = vxpose.xlu0.b32.cont [4/16] %v333_v15, 128  ;;  %v667_v17 = vpop.trf.xlu0  ;;  %v366_v14 = vld [vmem:[%s1525_s30 + $0x738] sm:$0xff]  ;;  %v365_v15 = vld [vmem:[%s1525_s30 + $0x730] sm:$0xff] }
 0x1c3   : > { %1067 = vst [vmem:[%s1597_s17 + $0x520] sm:$0xff] %v699_v16  ;;  %939 = vst [vmem:[%s1597_s17 + $0x120] sm:$0xff] %v667_v17 }
 0x1c6   : > { %811 = vxpose.xlu1.b32.cont [5/16] %v336_v18, 128  ;;  %v700_v20 = vpop.trf.xlu1  ;;  %779 = vxpose.xlu0.b32.cont [5/16] %v335_v19, 128  ;;  %v668_v21 = vpop.trf.xlu0  ;;  %v368_v18 = vld [vmem:[%s1525_s30 + $0x748] sm:$0xff]  ;;  %v367_v19 = vld [vmem:[%s1525_s30 + $0x740] sm:$0xff] }
 0x1c7   : > { %1075 = vst [vmem:[%s1597_s17 + $0x560] sm:$0xff] %v700_v20  ;;  %947 = vst [vmem:[%s1597_s17 + $0x160] sm:$0xff] %v668_v21 }
 0x1ca   : > { %812 = vxpose.xlu1.b32.cont [6/16] %v338_v22, 128  ;;  %v701_v24 = vpop.trf.xlu1  ;;  %780 = vxpose.xlu0.b32.cont [6/16] %v337_v23, 128  ;;  %v669_v25 = vpop.trf.xlu0  ;;  %v370_v22 = vld [vmem:[%s1525_s30 + $0x758] sm:$0xff]  ;;  %v369_v23 = vld [vmem:[%s1525_s30 + $0x750] sm:$0xff] }
 0x1cb   : > { %1083 = vst [vmem:[%s1597_s17 + $0x5a0] sm:$0xff] %v701_v24  ;;  %955 = vst [vmem:[%s1597_s17 + $0x1a0] sm:$0xff] %v669_v25 }
 0x1ce   : > { %813 = vxpose.xlu1.b32.cont [7/16] %v340_v26, 128  ;;  %v702_v28 = vpop.trf.xlu1  ;;  %781 = vxpose.xlu0.b32.cont [7/16] %v339_v27, 128  ;;  %v670_v29 = vpop.trf.xlu0  ;;  %v372_v26 = vld [vmem:[%s1525_s30 + $0x768] sm:$0xff]  ;;  %v371_v27 = vld [vmem:[%s1525_s30 + $0x760] sm:$0xff] }
 0x1cf   : > { %1091 = vst [vmem:[%s1597_s17 + $0x5e0] sm:$0xff] %v702_v28  ;;  %963 = vst [vmem:[%s1597_s17 + $0x1e0] sm:$0xff] %v670_v29 }
 0x1d2   : > { %814 = vxpose.xlu1.b32.cont [8/16] %v342_v30, 128  ;;  %v703_v32 = vpop.trf.xlu1  ;;  %782 = vxpose.xlu0.b32.cont [8/16] %v341_v31, 128  ;;  %v671_v33 = vpop.trf.xlu0  ;;  %v374_v30 = vld [vmem:[%s1525_s30 + $0x778] sm:$0xff]  ;;  %v373_v31 = vld [vmem:[%s1525_s30 + $0x770] sm:$0xff] }
 0x1d3   : > { %1099 = vst [vmem:[%s1597_s17 + $0x620] sm:$0xff] %v703_v32  ;;  %971 = vst [vmem:[%s1597_s17 + $0x220] sm:$0xff] %v671_v33 }
 0x1d6   : > { %815 = vxpose.xlu1.b32.cont [9/16] %v344_v34, 128  ;;  %v704_v36 = vpop.trf.xlu1  ;;  %783 = vxpose.xlu0.b32.cont [9/16] %v343_v35, 128  ;;  %v672_v37 = vpop.trf.xlu0  ;;  %v376_v34 = vld [vmem:[%s1525_s30 + $0x788] sm:$0xff]  ;;  %v375_v35 = vld [vmem:[%s1525_s30 + $0x780] sm:$0xff] }
 0x1d7   : > { %1107 = vst [vmem:[%s1597_s17 + $0x660] sm:$0xff] %v704_v36  ;;  %979 = vst [vmem:[%s1597_s17 + $0x260] sm:$0xff] %v672_v37 }
 0x1da   : > { %816 = vxpose.xlu1.b32.cont [10/16] %v346_v38, 128  ;;  %v705_v40 = vpop.trf.xlu1  ;;  %784 = vxpose.xlu0.b32.cont [10/16] %v345_v39, 128  ;;  %v673_v41 = vpop.trf.xlu0  ;;  %v378_v38 = vld [vmem:[%s1525_s30 + $0x798] sm:$0xff]  ;;  %v377_v39 = vld [vmem:[%s1525_s30 + $0x790] sm:$0xff] }
 0x1db   : > { %1115 = vst [vmem:[%s1597_s17 + $0x6a0] sm:$0xff] %v705_v40  ;;  %987 = vst [vmem:[%s1597_s17 + $0x2a0] sm:$0xff] %v673_v41 }
 0x1de   : > { %817 = vxpose.xlu1.b32.cont [11/16] %v348_v42, 128  ;;  %v706_v44 = vpop.trf.xlu1  ;;  %785 = vxpose.xlu0.b32.cont [11/16] %v347_v43, 128  ;;  %v674_v45 = vpop.trf.xlu0  ;;  %v380_v42 = vld [vmem:[%s1525_s30 + $0x7a8] sm:$0xff]  ;;  %v379_v43 = vld [vmem:[%s1525_s30 + $0x7a0] sm:$0xff] }
 0x1df   : > { %1123 = vst [vmem:[%s1597_s17 + $0x6e0] sm:$0xff] %v706_v44  ;;  %995 = vst [vmem:[%s1597_s17 + $0x2e0] sm:$0xff] %v674_v45 }
 0x1e2   : > { %818 = vxpose.xlu1.b32.cont [12/16] %v350_v46, 128  ;;  %v707_v48 = vpop.trf.xlu1  ;;  %786 = vxpose.xlu0.b32.cont [12/16] %v349_v47, 128  ;;  %v675_v49 = vpop.trf.xlu0  ;;  %v382_v46 = vld [vmem:[%s1525_s30 + $0x7b8] sm:$0xff]  ;;  %v381_v47 = vld [vmem:[%s1525_s30 + $0x7b0] sm:$0xff] }
 0x1e3   : > { %1131 = vst [vmem:[%s1597_s17 + $0x720] sm:$0xff] %v707_v48  ;;  %1003 = vst [vmem:[%s1597_s17 + $0x320] sm:$0xff] %v675_v49 }
 0x1e6   : > { %819 = vxpose.xlu1.b32.cont [13/16] %v352_v50, 128  ;;  %v708_v52 = vpop.trf.xlu1  ;;  %787 = vxpose.xlu0.b32.cont [13/16] %v351_v51, 128  ;;  %v676_v53 = vpop.trf.xlu0  ;;  %v384_v50 = vld [vmem:[%s1525_s30 + $0x7c8] sm:$0xff]  ;;  %v383_v51 = vld [vmem:[%s1525_s30 + $0x7c0] sm:$0xff] }
 0x1e7   : > { %1139 = vst [vmem:[%s1597_s17 + $0x760] sm:$0xff] %v708_v52  ;;  %1011 = vst [vmem:[%s1597_s17 + $0x360] sm:$0xff] %v676_v53 }
 0x1ea   : > { %820 = vxpose.xlu1.b32.cont [14/16] %v354_v54, 128  ;;  %v709_v56 = vpop.trf.xlu1  ;;  %788 = vxpose.xlu0.b32.cont [14/16] %v353_v55, 128  ;;  %v677_v57 = vpop.trf.xlu0  ;;  %v386_v54 = vld [vmem:[%s1525_s30 + $0x7d8] sm:$0xff]  ;;  %v385_v55 = vld [vmem:[%s1525_s30 + $0x7d0] sm:$0xff] }
 0x1eb   : > { %1147 = vst [vmem:[%s1597_s17 + $0x7a0] sm:$0xff] %v709_v56  ;;  %1019 = vst [vmem:[%s1597_s17 + $0x3a0] sm:$0xff] %v677_v57 }
 0x1ee   : > { %821 = vxpose.xlu1.b32.cont [15/16] %v356_v58, 128  ;;  %v710_v60 = vpop.trf.xlu1  ;;  %789 = vxpose.xlu0.b32.cont [15/16] %v355_v59, 128  ;;  %v678_v61 = vpop.trf.xlu0  ;;  %v388_v58 = vld [vmem:[%s1525_s30 + $0x7e8] sm:$0xff]  ;;  %v387_v59 = vld [vmem:[%s1525_s30 + $0x7e0] sm:$0xff] }
 0x1ef   : > { %1155 = vst [vmem:[%s1597_s17 + $0x7e0] sm:$0xff] %v710_v60  ;;  %1027 = vst [vmem:[%s1597_s17 + $0x3e0] sm:$0xff] %v678_v61 }
 0x1f2   : > { %822 = vxpose.xlu1.b32.end [16/16] %v358_v62, 128  ;;  %v759_v0 = vpop.trf.xlu1  ;;  %790 = vxpose.xlu0.b32.end [16/16] %v357_v63, 128  ;;  %v727_v1 = vpop.trf.xlu0  ;;  %v390_v62 = vld [vmem:[%s1525_s30 + $0x7f8] sm:$0xff]  ;;  %v389_v63 = vld [vmem:[%s1525_s30 + $0x7f0] sm:$0xff] }
 0x1f3   : > { %1036 = vst [vmem:[%s1597_s17 + $0x428] sm:$0xff] %v759_v0  ;;  %908 = vst [vmem:[%s1597_s17 + $0x28] sm:$0xff] %v727_v1 }
 0x1f6   : > { %871 = vxpose.xlu1.b32.start [1/16] %v360_v2, 128  ;;  %v760_v4 = vpop.trf.xlu1  ;;  %839 = vxpose.xlu0.b32.start [1/16] %v359_v3, 128  ;;  %v728_v5 = vpop.trf.xlu0 }
 0x1f7   : > { %1044 = vst [vmem:[%s1597_s17 + $0x468] sm:$0xff] %v760_v4  ;;  %916 = vst [vmem:[%s1597_s17 + $0x68] sm:$0xff] %v728_v5 }
 0x1fa   : > { %872 = vxpose.xlu1.b32.cont [2/16] %v362_v6, 128  ;;  %v761_v8 = vpop.trf.xlu1  ;;  %840 = vxpose.xlu0.b32.cont [2/16] %v361_v7, 128  ;;  %v729_v9 = vpop.trf.xlu0 }
 0x1fb   : > { %1052 = vst [vmem:[%s1597_s17 + $0x4a8] sm:$0xff] %v761_v8  ;;  %924 = vst [vmem:[%s1597_s17 + $0xa8] sm:$0xff] %v729_v9 }
 0x1fe   : > { %873 = vxpose.xlu1.b32.cont [3/16] %v364_v10, 128  ;;  %v762_v12 = vpop.trf.xlu1  ;;  %841 = vxpose.xlu0.b32.cont [3/16] %v363_v11, 128  ;;  %v730_v13 = vpop.trf.xlu0 }
 0x1ff   : > { %1060 = vst [vmem:[%s1597_s17 + $0x4e8] sm:$0xff] %v762_v12  ;;  %932 = vst [vmem:[%s1597_s17 + $0xe8] sm:$0xff] %v730_v13 }
 0x202   : > { %874 = vxpose.xlu1.b32.cont [4/16] %v366_v14, 128  ;;  %v763_v16 = vpop.trf.xlu1  ;;  %842 = vxpose.xlu0.b32.cont [4/16] %v365_v15, 128  ;;  %v731_v17 = vpop.trf.xlu0 }
 0x203   : > { %1068 = vst [vmem:[%s1597_s17 + $0x528] sm:$0xff] %v763_v16  ;;  %940 = vst [vmem:[%s1597_s17 + $0x128] sm:$0xff] %v731_v17 }
 0x206   : > { %875 = vxpose.xlu1.b32.cont [5/16] %v368_v18, 128  ;;  %v764_v20 = vpop.trf.xlu1  ;;  %843 = vxpose.xlu0.b32.cont [5/16] %v367_v19, 128  ;;  %v732_v21 = vpop.trf.xlu0 }
 0x207   : > { %1076 = vst [vmem:[%s1597_s17 + $0x568] sm:$0xff] %v764_v20  ;;  %948 = vst [vmem:[%s1597_s17 + $0x168] sm:$0xff] %v732_v21 }
 0x20a   : > { %876 = vxpose.xlu1.b32.cont [6/16] %v370_v22, 128  ;;  %v765_v24 = vpop.trf.xlu1  ;;  %844 = vxpose.xlu0.b32.cont [6/16] %v369_v23, 128  ;;  %v733_v25 = vpop.trf.xlu0 }
 0x20b   : > { %1084 = vst [vmem:[%s1597_s17 + $0x5a8] sm:$0xff] %v765_v24  ;;  %956 = vst [vmem:[%s1597_s17 + $0x1a8] sm:$0xff] %v733_v25 }
 0x20e   : > { %877 = vxpose.xlu1.b32.cont [7/16] %v372_v26, 128  ;;  %v766_v28 = vpop.trf.xlu1  ;;  %845 = vxpose.xlu0.b32.cont [7/16] %v371_v27, 128  ;;  %v734_v29 = vpop.trf.xlu0 }
 0x20f   : > { %1092 = vst [vmem:[%s1597_s17 + $0x5e8] sm:$0xff] %v766_v28  ;;  %964 = vst [vmem:[%s1597_s17 + $0x1e8] sm:$0xff] %v734_v29 }
 0x212   : > { %878 = vxpose.xlu1.b32.cont [8/16] %v374_v30, 128  ;;  %v767_v32 = vpop.trf.xlu1  ;;  %846 = vxpose.xlu0.b32.cont [8/16] %v373_v31, 128  ;;  %v735_v33 = vpop.trf.xlu0 }
 0x213   : > { %1100 = vst [vmem:[%s1597_s17 + $0x628] sm:$0xff] %v767_v32  ;;  %972 = vst [vmem:[%s1597_s17 + $0x228] sm:$0xff] %v735_v33 }
 0x216   : > { %879 = vxpose.xlu1.b32.cont [9/16] %v376_v34, 128  ;;  %v768_v36 = vpop.trf.xlu1  ;;  %847 = vxpose.xlu0.b32.cont [9/16] %v375_v35, 128  ;;  %v736_v37 = vpop.trf.xlu0 }
 0x217   : > { %1108 = vst [vmem:[%s1597_s17 + $0x668] sm:$0xff] %v768_v36  ;;  %980 = vst [vmem:[%s1597_s17 + $0x268] sm:$0xff] %v736_v37 }
 0x21a   : > { %880 = vxpose.xlu1.b32.cont [10/16] %v378_v38, 128  ;;  %v769_v40 = vpop.trf.xlu1  ;;  %848 = vxpose.xlu0.b32.cont [10/16] %v377_v39, 128  ;;  %v737_v41 = vpop.trf.xlu0 }
 0x21b   : > { %1116 = vst [vmem:[%s1597_s17 + $0x6a8] sm:$0xff] %v769_v40  ;;  %988 = vst [vmem:[%s1597_s17 + $0x2a8] sm:$0xff] %v737_v41 }
 0x21e   : > { %881 = vxpose.xlu1.b32.cont [11/16] %v380_v42, 128  ;;  %v770_v44 = vpop.trf.xlu1  ;;  %849 = vxpose.xlu0.b32.cont [11/16] %v379_v43, 128  ;;  %v738_v45 = vpop.trf.xlu0 }
 0x21f   : > { %1124 = vst [vmem:[%s1597_s17 + $0x6e8] sm:$0xff] %v770_v44  ;;  %996 = vst [vmem:[%s1597_s17 + $0x2e8] sm:$0xff] %v738_v45 }
 0x222   : > { %882 = vxpose.xlu1.b32.cont [12/16] %v382_v46, 128  ;;  %v771_v48 = vpop.trf.xlu1  ;;  %850 = vxpose.xlu0.b32.cont [12/16] %v381_v47, 128  ;;  %v739_v49 = vpop.trf.xlu0 }
 0x223   : > { %1132 = vst [vmem:[%s1597_s17 + $0x728] sm:$0xff] %v771_v48  ;;  %1004 = vst [vmem:[%s1597_s17 + $0x328] sm:$0xff] %v739_v49 }
 0x226   : > { %883 = vxpose.xlu1.b32.cont [13/16] %v384_v50, 128  ;;  %v772_v52 = vpop.trf.xlu1  ;;  %851 = vxpose.xlu0.b32.cont [13/16] %v383_v51, 128  ;;  %v740_v53 = vpop.trf.xlu0 }
 0x227   : > { %1140 = vst [vmem:[%s1597_s17 + $0x768] sm:$0xff] %v772_v52  ;;  %1012 = vst [vmem:[%s1597_s17 + $0x368] sm:$0xff] %v740_v53 }
 0x22a   : > { %884 = vxpose.xlu1.b32.cont [14/16] %v386_v54, 128  ;;  %v773_v56 = vpop.trf.xlu1  ;;  %852 = vxpose.xlu0.b32.cont [14/16] %v385_v55, 128  ;;  %v741_v57 = vpop.trf.xlu0 }
 0x22b   : > { %1148 = vst [vmem:[%s1597_s17 + $0x7a8] sm:$0xff] %v773_v56  ;;  %1020 = vst [vmem:[%s1597_s17 + $0x3a8] sm:$0xff] %v741_v57 }
 0x22e   : > { %885 = vxpose.xlu1.b32.cont [15/16] %v388_v58, 128  ;;  %v774_v60 = vpop.trf.xlu1  ;;  %853 = vxpose.xlu0.b32.cont [15/16] %v387_v59, 128  ;;  %v742_v61 = vpop.trf.xlu0 }
 0x22f   : > { %1156 = vst [vmem:[%s1597_s17 + $0x7e8] sm:$0xff] %v774_v60  ;;  %1028 = vst [vmem:[%s1597_s17 + $0x3e8] sm:$0xff] %v742_v61 }
 0x232   : > { %886 = vxpose.xlu1.b32.end [16/16] %v390_v62, 128  ;;  %v823_v0 = vpop.trf.xlu1  ;;  %854 = vxpose.xlu0.b32.end [16/16] %v389_v63, 128  ;;  %v791_v1 = vpop.trf.xlu0 }
 0x233   : > { %1037 = vst [vmem:[%s1597_s17 + $0x430] sm:$0xff] %v823_v0  ;;  %909 = vst [vmem:[%s1597_s17 + $0x30] sm:$0xff] %v791_v1 }
 0x236   : > { %v824_v2 = vpop.trf.xlu1  ;;  %v792_v3 = vpop.trf.xlu0 }
 0x237   : > { %1045 = vst [vmem:[%s1597_s17 + $0x470] sm:$0xff] %v824_v2  ;;  %917 = vst [vmem:[%s1597_s17 + $0x70] sm:$0xff] %v792_v3 }
 0x23a   : > { %v825_v4 = vpop.trf.xlu1  ;;  %v793_v5 = vpop.trf.xlu0 }
 0x23b   : > { %1053 = vst [vmem:[%s1597_s17 + $0x4b0] sm:$0xff] %v825_v4  ;;  %925 = vst [vmem:[%s1597_s17 + $0xb0] sm:$0xff] %v793_v5 }
 0x23e   : > { %v826_v6 = vpop.trf.xlu1  ;;  %v794_v7 = vpop.trf.xlu0 }
 0x23f   : > { %1061 = vst [vmem:[%s1597_s17 + $0x4f0] sm:$0xff] %v826_v6  ;;  %933 = vst [vmem:[%s1597_s17 + $0xf0] sm:$0xff] %v794_v7 }
 0x242   : > { %v827_v8 = vpop.trf.xlu1  ;;  %v795_v9 = vpop.trf.xlu0 }
 0x243   : > { %1069 = vst [vmem:[%s1597_s17 + $0x530] sm:$0xff] %v827_v8  ;;  %941 = vst [vmem:[%s1597_s17 + $0x130] sm:$0xff] %v795_v9 }
 0x246   : > { %v828_v10 = vpop.trf.xlu1  ;;  %v796_v11 = vpop.trf.xlu0 }
 0x247   : > { %1077 = vst [vmem:[%s1597_s17 + $0x570] sm:$0xff] %v828_v10  ;;  %949 = vst [vmem:[%s1597_s17 + $0x170] sm:$0xff] %v796_v11 }
 0x24a   : > { %v829_v12 = vpop.trf.xlu1  ;;  %v797_v13 = vpop.trf.xlu0 }
 0x24b   : > { %1085 = vst [vmem:[%s1597_s17 + $0x5b0] sm:$0xff] %v829_v12  ;;  %957 = vst [vmem:[%s1597_s17 + $0x1b0] sm:$0xff] %v797_v13 }
 0x24e   : > { %v830_v14 = vpop.trf.xlu1  ;;  %v798_v15 = vpop.trf.xlu0 }
 0x24f   : > { %1093 = vst [vmem:[%s1597_s17 + $0x5f0] sm:$0xff] %v830_v14  ;;  %965 = vst [vmem:[%s1597_s17 + $0x1f0] sm:$0xff] %v798_v15 }
 0x252   : > { %v831_v16 = vpop.trf.xlu1  ;;  %v799_v17 = vpop.trf.xlu0 }
 0x253   : > { %1101 = vst [vmem:[%s1597_s17 + $0x630] sm:$0xff] %v831_v16  ;;  %973 = vst [vmem:[%s1597_s17 + $0x230] sm:$0xff] %v799_v17 }
 0x256   : > { %v832_v18 = vpop.trf.xlu1  ;;  %v800_v19 = vpop.trf.xlu0 }
 0x257   : > { %1109 = vst [vmem:[%s1597_s17 + $0x670] sm:$0xff] %v832_v18  ;;  %981 = vst [vmem:[%s1597_s17 + $0x270] sm:$0xff] %v800_v19 }
 0x25a   : > { %v833_v20 = vpop.trf.xlu1  ;;  %v801_v21 = vpop.trf.xlu0 }
 0x25b   : > { %1117 = vst [vmem:[%s1597_s17 + $0x6b0] sm:$0xff] %v833_v20  ;;  %989 = vst [vmem:[%s1597_s17 + $0x2b0] sm:$0xff] %v801_v21 }
 0x25e   : > { %v834_v22 = vpop.trf.xlu1  ;;  %v802_v23 = vpop.trf.xlu0 }
 0x25f   : > { %1125 = vst [vmem:[%s1597_s17 + $0x6f0] sm:$0xff] %v834_v22  ;;  %997 = vst [vmem:[%s1597_s17 + $0x2f0] sm:$0xff] %v802_v23 }
 0x262   : > { %v835_v24 = vpop.trf.xlu1  ;;  %v803_v25 = vpop.trf.xlu0 }
 0x263   : > { %1133 = vst [vmem:[%s1597_s17 + $0x730] sm:$0xff] %v835_v24  ;;  %1005 = vst [vmem:[%s1597_s17 + $0x330] sm:$0xff] %v803_v25 }
 0x266   : > { %v836_v26 = vpop.trf.xlu1  ;;  %v804_v27 = vpop.trf.xlu0 }
 0x267   : > { %1141 = vst [vmem:[%s1597_s17 + $0x770] sm:$0xff] %v836_v26  ;;  %1013 = vst [vmem:[%s1597_s17 + $0x370] sm:$0xff] %v804_v27 }
 0x26a   : > { %v837_v28 = vpop.trf.xlu1  ;;  %v805_v29 = vpop.trf.xlu0 }
 0x26b   : > { %1149 = vst [vmem:[%s1597_s17 + $0x7b0] sm:$0xff] %v837_v28  ;;  %1021 = vst [vmem:[%s1597_s17 + $0x3b0] sm:$0xff] %v805_v29 }
 0x26e   : > { %v838_v30 = vpop.trf.xlu1  ;;  %v806_v31 = vpop.trf.xlu0 }
 0x26f   : > { %1157 = vst [vmem:[%s1597_s17 + $0x7f0] sm:$0xff] %v838_v30  ;;  %1029 = vst [vmem:[%s1597_s17 + $0x3f0] sm:$0xff] %v806_v31 }
 0x272   : > { %v887_v32 = vpop.trf.xlu1  ;;  %v855_v33 = vpop.trf.xlu0 }
 0x273   : > { %1038 = vst [vmem:[%s1597_s17 + $0x438] sm:$0xff] %v887_v32  ;;  %910 = vst [vmem:[%s1597_s17 + $0x38] sm:$0xff] %v855_v33 }
 0x276   : > { %v888_v34 = vpop.trf.xlu1  ;;  %v856_v35 = vpop.trf.xlu0 }
 0x277   : > { %1046 = vst [vmem:[%s1597_s17 + $0x478] sm:$0xff] %v888_v34  ;;  %918 = vst [vmem:[%s1597_s17 + $0x78] sm:$0xff] %v856_v35 }
 0x27a   : > { %v889_v36 = vpop.trf.xlu1  ;;  %v857_v37 = vpop.trf.xlu0 }
 0x27b   : > { %1054 = vst [vmem:[%s1597_s17 + $0x4b8] sm:$0xff] %v889_v36  ;;  %926 = vst [vmem:[%s1597_s17 + $0xb8] sm:$0xff] %v857_v37 }
 0x27e   : > { %v890_v38 = vpop.trf.xlu1  ;;  %v858_v39 = vpop.trf.xlu0 }
 0x27f   : > { %1062 = vst [vmem:[%s1597_s17 + $0x4f8] sm:$0xff] %v890_v38  ;;  %934 = vst [vmem:[%s1597_s17 + $0xf8] sm:$0xff] %v858_v39 }
 0x282   : > { %v891_v40 = vpop.trf.xlu1  ;;  %v859_v41 = vpop.trf.xlu0 }
 0x283   : > { %1070 = vst [vmem:[%s1597_s17 + $0x538] sm:$0xff] %v891_v40  ;;  %942 = vst [vmem:[%s1597_s17 + $0x138] sm:$0xff] %v859_v41 }
 0x286   : > { %v892_v42 = vpop.trf.xlu1  ;;  %v860_v43 = vpop.trf.xlu0 }
 0x287   : > { %1078 = vst [vmem:[%s1597_s17 + $0x578] sm:$0xff] %v892_v42  ;;  %950 = vst [vmem:[%s1597_s17 + $0x178] sm:$0xff] %v860_v43 }
 0x28a   : > { %v893_v44 = vpop.trf.xlu1  ;;  %v861_v45 = vpop.trf.xlu0 }
 0x28b   : > { %1086 = vst [vmem:[%s1597_s17 + $0x5b8] sm:$0xff] %v893_v44  ;;  %958 = vst [vmem:[%s1597_s17 + $0x1b8] sm:$0xff] %v861_v45 }
 0x28e   : > { %v894_v46 = vpop.trf.xlu1  ;;  %v862_v47 = vpop.trf.xlu0 }
 0x28f   : > { %1094 = vst [vmem:[%s1597_s17 + $0x5f8] sm:$0xff] %v894_v46  ;;  %966 = vst [vmem:[%s1597_s17 + $0x1f8] sm:$0xff] %v862_v47 }
 0x292   : > { %v895_v48 = vpop.trf.xlu1  ;;  %v863_v49 = vpop.trf.xlu0 }
 0x293   : > { %1102 = vst [vmem:[%s1597_s17 + $0x638] sm:$0xff] %v895_v48  ;;  %974 = vst [vmem:[%s1597_s17 + $0x238] sm:$0xff] %v863_v49 }
 0x296   : > { %v896_v50 = vpop.trf.xlu1  ;;  %v864_v51 = vpop.trf.xlu0 }
 0x297   : > { %1110 = vst [vmem:[%s1597_s17 + $0x678] sm:$0xff] %v896_v50  ;;  %982 = vst [vmem:[%s1597_s17 + $0x278] sm:$0xff] %v864_v51 }
 0x29a   : > { %v897_v52 = vpop.trf.xlu1  ;;  %v865_v53 = vpop.trf.xlu0 }
 0x29b   : > { %1118 = vst [vmem:[%s1597_s17 + $0x6b8] sm:$0xff] %v897_v52  ;;  %990 = vst [vmem:[%s1597_s17 + $0x2b8] sm:$0xff] %v865_v53 }
 0x29e   : > { %v898_v54 = vpop.trf.xlu1  ;;  %v866_v55 = vpop.trf.xlu0 }
 0x29f   : > { %1126 = vst [vmem:[%s1597_s17 + $0x6f8] sm:$0xff] %v898_v54  ;;  %998 = vst [vmem:[%s1597_s17 + $0x2f8] sm:$0xff] %v866_v55 }
 0x2a2   : > { %v899_v56 = vpop.trf.xlu1  ;;  %v867_v57 = vpop.trf.xlu0 }
 0x2a3   : > { %1134 = vst [vmem:[%s1597_s17 + $0x738] sm:$0xff] %v899_v56  ;;  %1006 = vst [vmem:[%s1597_s17 + $0x338] sm:$0xff] %v867_v57 }
 0x2a6   : > { %v900_v58 = vpop.trf.xlu1  ;;  %v868_v59 = vpop.trf.xlu0 }
 0x2a7   : > { %1142 = vst [vmem:[%s1597_s17 + $0x778] sm:$0xff] %v900_v58  ;;  %1014 = vst [vmem:[%s1597_s17 + $0x378] sm:$0xff] %v868_v59 }
 0x2aa   : > { %v901_v60 = vpop.trf.xlu1  ;;  %v869_v61 = vpop.trf.xlu0 }
 0x2ab   : > { %1150 = vst [vmem:[%s1597_s17 + $0x7b8] sm:$0xff] %v901_v60  ;;  %1022 = vst [vmem:[%s1597_s17 + $0x3b8] sm:$0xff] %v869_v61 }
 0x2ae   : > { %v902_v62 = vpop.trf.xlu1  ;;  %v870_v63 = vpop.trf.xlu0 }
 0x2af   : > { %1158 = vst [vmem:[%s1597_s17 + $0x7f8] sm:$0xff] %v902_v62  ;;  %1030 = vst [vmem:[%s1597_s17 + $0x3f8] sm:$0xff] %v870_v63 }
 0x2b0   : > { %1353 = shalt.err (!%p1350_p10)
}
 0x2b1   : > { %s1354_s13 = scalar_lea.hbm %s2050_s2, 32768  ;;  %s1358_s20 = scalar_lea.hbm %s2098_s1, 65536 }
 0x2b2   : > { %p1355_p0 = scmp.ne.s32.totalorder %s2050_s2, %s1354_s13  ;;  %p1359_p1 = scmp.lt.s32.totalorder %s2050_s2, %s2098_s1 }
 0x2b3   : > { %p1360_p3 = scmp.lt.s32.totalorder %s1358_s20, %s1354_s13 }
 0x2b4   : > { %p1356_p2 = pnand %p1355_p0, %p2107_p12 }
 0x2b5   : > { %p1361_p6 = por %p1360_p3, %p1359_p1 }
 0x2b6   : > { %p1357_p9 = pneg %p1356_p2 }
 0x2b8   : > { %p1362_p11 = pnand %p1361_p6, %p1357_p9 }
 0x2ba   : > { %1365 = shalt.err (!%p1362_p11)
}
 0x2bb   : > { %s1410_s24 = smov 1024   ;;  %s1411_s26 = smov 64  }
 0x2bc   : > { %1264 = dma.vmem_to_hbm [thread:$0]  (%p2107_p12), %s2052_s27, 32768, %s2050_s2, %s1160_s10, %s1410_s24, %s1410_s24, %s1411_s26  }
 0x2bd PF: > { %s1188_s30 = sand.u32 1, %s1392_s6   ;;  %p2108_p13 = scmp.ne.s32.totalorder %s2104_s19, 0 }
 0x2be   : > { %p2109_p4 = scmp.ge.s32.totalorder %s1404_s9, 2  ;;  %s1189_s17 = scalar_lea.sflag [#allocation4], %s1188_s30 }
 0x2c0   : > { %p1271_p5 = pnand %p2109_p4, %p2108_p13 }
 0x2c2   : > { %p1272_p7 = pneg %p1271_p5 }
 0x2c4   : > { %1387 = dma.done.wait (%p1272_p7), %s1189_s17, 32768  }
 0x2c5   : > { %1389 = vsyncadd (%p1272_p7), %s1189_s17, 4294934528  ;;  %p14_p8 = scmp.ge.s32.totalorder %s1447_s12, 4   ;;  %s2110_s6 = smov %s1396_s7 }
 0x2c6   : > { %s2111_s7 = smov %s1400_s8  ;;  %s2112_s8 = smov %s1459_s15 }
 0x2c7   : > { %s2113_s9 = smov %s1447_s12  ;;  %16 = sbr.rel (!%p14_p8) target bundleno = 5 (0x5), region = 69 }
 0x2cc   :  { %1194 = vsyncpa [#allocation3], 1 }
 0x2cd   :  { %1196 = vsyncpa [#allocation3 + $0x1], 1 }
 0x2ce   :  { %1197 = vsyncpa [#allocation4], 1 }
 0x2cf   :  { %1199 = vsyncpa [#allocation4 + $0x1], 1 }

</bundles_post_ra>
